<compile_context>
chip_gen: v7x
topology: tpu7x:2x2x1
jax: 0.10.0
libtpu: 0.0.40
codegen_flags: <defaults>
</compile_context>

<pallas_src>
import functools

import jax
import jax.numpy as jnp
import numpy as np
from jax import lax
from jax.experimental import pallas as pl
from jax.experimental.pallas import tpu as pltpu

# ---- small, synthetic sizes (consistent with the module's forward) ----------
B = 2          # batch
T = 8          # sequence length (mel frames)
MEL = 16       # mel_n_channels
H = 32         # model_hidden_size
E = 32         # model_embedding_size
NUM_LAYERS = 3


def speaker_encoder_kernel(
    x_ref,                          # (T*B, MEL) time-major, flattened
    wih0_ref, whh0_ref, b0_ref,     # layer 0
    wih1_ref, whh1_ref, b1_ref,     # layer 1
    wih2_ref, whh2_ref, b2_ref,     # layer 2
    wlin_ref, blin_ref,             # final linear
    out_ref,                        # (B, E)
    *, t_steps, batch, hidden,
):
    layer_weights = (
        (wih0_ref, whh0_ref, b0_ref),
        (wih1_ref, whh1_ref, b1_ref),
        (wih2_ref, whh2_ref, b2_ref),
    )
    num_layers = len(layer_weights)

    x_flat = x_ref[...]                                   # (T*B, D_in)

    h = None
    for layer_idx, (wih_ref, whh_ref, b_ref) in enumerate(layer_weights):
        w_ih_T = wih_ref[...]                             # (D_in, 4H)
        w_hh_T = whh_ref[...]                             # (H, 4H)
        bias = b_ref[...]                                 # (1, 4H)

        # Batched input projection for the whole sequence: ONE matmul/layer.
        gates_in = jnp.dot(x_flat, w_ih_T,
                           preferred_element_type=jnp.float32) + bias  # (T*B, 4H)

        h = jnp.zeros((batch, hidden), jnp.float32)
        c = jnp.zeros((batch, hidden), jnp.float32)
        hs = []
        # Fully unrolled recurrence (T is small and static).
        for t in range(t_steps):
            gates = gates_in[t * batch:(t + 1) * batch, :] + jnp.dot(
                h, w_hh_T, preferred_element_type=jnp.float32)          # (B, 4H)
            i = jax.nn.sigmoid(gates[:, 0 * hidden:1 * hidden])
            f = jax.nn.sigmoid(gates[:, 1 * hidden:2 * hidden])
            g = jnp.tanh(gates[:, 2 * hidden:3 * hidden])
            o = jax.nn.sigmoid(gates[:, 3 * hidden:4 * hidden])
            c = f * c + i * g
            h = o * jnp.tanh(c)
            if layer_idx < num_layers - 1:
                hs.append(h)                              # keep seq in vregs

        if layer_idx < num_layers - 1:
            x_flat = jnp.concatenate(hs, axis=0)          # (T*B, H) for next layer
        # last layer: sequence never materialized, only h (== hidden[-1]) kept

    # Linear + ReLU + L2-normalize (torch.norm along dim=1, keepdim)
    emb = jnp.dot(h, wlin_ref[...], preferred_element_type=jnp.float32)
    emb = jnp.maximum(emb + blin_ref[...], 0.0)
    sq = jnp.sum(emb * emb, axis=1, keepdims=True)
    # NOTE: matches PyTorch — an all-zero row after ReLU yields NaN (0/0).
    out_ref[...] = emb * lax.rsqrt(sq)


def prepare_params(params):
    """Hoisted out of the hot path: transpose weights / fuse biases once."""
    prepped = []
    for l in range(NUM_LAYERS):
        w_ih, w_hh, b_ih, b_hh = params[f"lstm{l}"]
        prepped += [
            jnp.transpose(w_ih).astype(jnp.float32),              # (D_in, 4H)
            jnp.transpose(w_hh).astype(jnp.float32),              # (H, 4H)
            (b_ih + b_hh).reshape(1, 4 * H).astype(jnp.float32),  # (1, 4H)
        ]
    w_lin, b_lin = params["linear"]
    prepped += [
        jnp.transpose(w_lin).astype(jnp.float32),                 # (H, E)
        b_lin.reshape(1, E).astype(jnp.float32),                  # (1, E)
    ]
    return prepped


@jax.jit
def speaker_encoder_forward(mels, prepped):
    """mels: (B, T, MEL) float32 (batch_first, like PyTorch)."""
    # Time-major, flattened to (T*B, MEL) so the kernel's per-layer input
    # projection is one dense matmul (layout glue done in XLA, not in-kernel).
    x = jnp.transpose(mels, (1, 0, 2)).reshape(T * B, MEL).astype(jnp.float32)

    vmem_spec = pl.BlockSpec(memory_space=pltpu.MemorySpace.VMEM)
    kernel = functools.partial(
        speaker_encoder_kernel, t_steps=T, batch=B, hidden=H)

    return pl.pallas_call(
        kernel,
        out_shape=jax.ShapeDtypeStruct((B, E), jnp.float32),
        in_specs=[vmem_spec] * (1 + len(prepped)),
        out_specs=vmem_spec,
    )(x, *prepped)


# ------------------------- pure-JAX reference --------------------------------
def reference_forward(mels, params):
    x = mels.astype(jnp.float32)  # (B, T, D)
    for l in range(NUM_LAYERS):
        w_ih, w_hh, b_ih, b_hh = params[f"lstm{l}"]

        def step(carry, x_t, w_ih=w_ih, w_hh=w_hh, b_ih=b_ih, b_hh=b_hh):
            h, c = carry
            gates = x_t @ w_ih.T + h @ w_hh.T + b_ih + b_hh
            i, f, g, o = jnp.split(gates, 4, axis=-1)
            c = jax.nn.sigmoid(f) * c + jax.nn.sigmoid(i) * jnp.tanh(g)
            h = jax.nn.sigmoid(o) * jnp.tanh(c)
            return (h, c), h

        h0 = jnp.zeros((x.shape[0], H), jnp.float32)
        (h_fin, _), ys = lax.scan(step, (h0, h0), jnp.swapaxes(x, 0, 1))
        x = jnp.swapaxes(ys, 0, 1)
    w_lin, b_lin = params["linear"]
    e = jnp.maximum(h_fin @ w_lin.T + b_lin, 0.0)
    return e / jnp.linalg.norm(e, axis=1, keepdims=True)


# ------------------------- deterministic params ------------------------------
def make_params(key):
    params = {}
    scale = 1.0 / np.sqrt(H)
    for l in range(NUM_LAYERS):
        d_in = MEL if l == 0 else H
        key, k1, k2, k3, k4 = jax.random.split(key, 5)
        params[f"lstm{l}"] = (
            jax.random.uniform(k1, (4 * H, d_in), jnp.float32, -scale, scale),
            jax.random.uniform(k2, (4 * H, H), jnp.float32, -scale, scale),
            jax.random.uniform(k3, (4 * H,), jnp.float32, -scale, scale),
            jax.random.uniform(k4, (4 * H,), jnp.float32, -scale, scale),
        )
    key, k1, k2 = jax.random.split(key, 3)
    params["linear"] = (
        jax.random.uniform(k1, (E, H), jnp.float32, -scale, scale),
        jax.random.uniform(k2, (E,), jnp.float32, -scale, scale),
    )
    return params


if __name__ == "__main__":
    root = jax.random.PRNGKey(0)
    k_param, k_mel = jax.random.split(root)
    params = make_params(k_param)
    mels = jax.random.normal(k_mel, (B, T, MEL), jnp.float32)

    prepped = prepare_params(params)      # weight prep hoisted out of hot path
    out = speaker_encoder_forward(mels, prepped)
    out = jax.block_until_ready(out)

    ref = jax.block_until_ready(reference_forward(mels, params))
    np.testing.assert_allclose(np.asarray(out), np.asarray(ref),
                               atol=1e-4, rtol=1e-4)

    print("KERNEL_OK")
</pallas_src>

<mosaic_0001>
module attributes {stable_mosaic.version = 11 : i64} {
  func.func @speaker_encoder_kernel(%arg0: memref<16x16xf32, #tpu.memory_space<vmem>>, %arg1: memref<16x128xf32, #tpu.memory_space<vmem>>, %arg2: memref<32x128xf32, #tpu.memory_space<vmem>>, %arg3: memref<1x128xf32, #tpu.memory_space<vmem>>, %arg4: memref<32x128xf32, #tpu.memory_space<vmem>>, %arg5: memref<32x128xf32, #tpu.memory_space<vmem>>, %arg6: memref<1x128xf32, #tpu.memory_space<vmem>>, %arg7: memref<32x128xf32, #tpu.memory_space<vmem>>, %arg8: memref<32x128xf32, #tpu.memory_space<vmem>>, %arg9: memref<1x128xf32, #tpu.memory_space<vmem>>, %arg10: memref<32x32xf32, #tpu.memory_space<vmem>>, %arg11: memref<1x32xf32, #tpu.memory_space<vmem>>, %arg12: memref<2x32xf32, #tpu.memory_space<vmem>>) attributes {dimension_semantics = [], scalar_prefetch = 0 : i64, scratch_operands = 0 : i64, tpu.core_type = #tpu.core_type<tc>} {
    %c0 = arith.constant 0 : index
    %c0_0 = arith.constant 0 : index
    %0 = vector.load %arg0[%c0, %c0_0] : memref<16x16xf32, #tpu.memory_space<vmem>>, vector<16x16xf32>
    %c0_1 = arith.constant 0 : index
    %c0_2 = arith.constant 0 : index
    %1 = vector.load %arg1[%c0_1, %c0_2] : memref<16x128xf32, #tpu.memory_space<vmem>>, vector<16x128xf32>
    %c0_3 = arith.constant 0 : index
    %c0_4 = arith.constant 0 : index
    %2 = vector.load %arg2[%c0_3, %c0_4] : memref<32x128xf32, #tpu.memory_space<vmem>>, vector<32x128xf32>
    %c0_5 = arith.constant 0 : index
    %c0_6 = arith.constant 0 : index
    %3 = vector.load %arg3[%c0_5, %c0_6] : memref<1x128xf32, #tpu.memory_space<vmem>>, vector<1x128xf32>
    %cst = arith.constant dense<0.000000e+00> : vector<16x128xf32>
    %4 = tpu.matmul %0, %1, %cst {dimension_numbers = #tpu.dot_dimension_numbers<[1], [0], [0], [1], [0, 0, 1, 1], [], []>} : vector<16x16xf32>, vector<16x128xf32>, vector<16x128xf32> -> vector<16x128xf32>
    %5 = vector.broadcast %3 : vector<1x128xf32> to vector<16x128xf32>
    %6 = arith.addf %4, %5 : vector<16x128xf32>
    %cst_7 = arith.constant 0.000000e+00 : f32
    %7 = vector.broadcast %cst_7 : f32 to vector<2x32xf32>
    %cst_8 = arith.constant 0.000000e+00 : f32
    %8 = vector.broadcast %cst_8 : f32 to vector<2x32xf32>
    %9 = vector.extract_strided_slice %6 {offsets = [0, 0], sizes = [2, 128], strides = [1, 1]} : vector<16x128xf32> to vector<2x128xf32>
    %cst_9 = arith.constant dense<0.000000e+00> : vector<2x128xf32>
    %10 = tpu.matmul %7, %2, %cst_9 {dimension_numbers = #tpu.dot_dimension_numbers<[1], [0], [0], [1], [0, 0, 1, 1], [], []>} : vector<2x32xf32>, vector<32x128xf32>, vector<2x128xf32> -> vector<2x128xf32>
    %11 = arith.addf %9, %10 : vector<2x128xf32>
    %12 = vector.extract_strided_slice %11 {offsets = [0, 0], sizes = [2, 32], strides = [1, 1]} : vector<2x128xf32> to vector<2x32xf32>
    %13 = arith.negf %12 : vector<2x32xf32>
    %14 = math.exp %13 : vector<2x32xf32>
    %cst_10 = arith.constant 1.000000e+00 : f32
    %15 = vector.broadcast %cst_10 : f32 to vector<2x32xf32>
    %16 = arith.addf %15, %14 : vector<2x32xf32>
    %17 = arith.divf %15, %16 : vector<2x32xf32>
    %18 = vector.extract_strided_slice %11 {offsets = [0, 32], sizes = [2, 32], strides = [1, 1]} : vector<2x128xf32> to vector<2x32xf32>
    %19 = arith.negf %18 : vector<2x32xf32>
    %20 = math.exp %19 : vector<2x32xf32>
    %cst_11 = arith.constant 1.000000e+00 : f32
    %21 = vector.broadcast %cst_11 : f32 to vector<2x32xf32>
    %22 = arith.addf %21, %20 : vector<2x32xf32>
    %23 = arith.divf %21, %22 : vector<2x32xf32>
    %24 = vector.extract_strided_slice %11 {offsets = [0, 64], sizes = [2, 32], strides = [1, 1]} : vector<2x128xf32> to vector<2x32xf32>
    %25 = math.tanh %24 : vector<2x32xf32>
    %26 = vector.extract_strided_slice %11 {offsets = [0, 96], sizes = [2, 32], strides = [1, 1]} : vector<2x128xf32> to vector<2x32xf32>
    %27 = arith.negf %26 : vector<2x32xf32>
    %28 = math.exp %27 : vector<2x32xf32>
    %cst_12 = arith.constant 1.000000e+00 : f32
    %29 = vector.broadcast %cst_12 : f32 to vector<2x32xf32>
    %30 = arith.addf %29, %28 : vector<2x32xf32>
    %31 = arith.divf %29, %30 : vector<2x32xf32>
    %32 = arith.mulf %23, %8 : vector<2x32xf32>
    %33 = arith.mulf %17, %25 : vector<2x32xf32>
    %34 = arith.addf %32, %33 : vector<2x32xf32>
    %35 = math.tanh %34 : vector<2x32xf32>
    %36 = arith.mulf %31, %35 : vector<2x32xf32>
    %37 = vector.extract_strided_slice %6 {offsets = [2, 0], sizes = [2, 128], strides = [1, 1]} : vector<16x128xf32> to vector<2x128xf32>
    %cst_13 = arith.constant dense<0.000000e+00> : vector<2x128xf32>
    %38 = tpu.matmul %36, %2, %cst_13 {dimension_numbers = #tpu.dot_dimension_numbers<[1], [0], [0], [1], [0, 0, 1, 1], [], []>} : vector<2x32xf32>, vector<32x128xf32>, vector<2x128xf32> -> vector<2x128xf32>
    %39 = arith.addf %37, %38 : vector<2x128xf32>
    %40 = vector.extract_strided_slice %39 {offsets = [0, 0], sizes = [2, 32], strides = [1, 1]} : vector<2x128xf32> to vector<2x32xf32>
    %41 = arith.negf %40 : vector<2x32xf32>
    %42 = math.exp %41 : vector<2x32xf32>
    %cst_14 = arith.constant 1.000000e+00 : f32
    %43 = vector.broadcast %cst_14 : f32 to vector<2x32xf32>
    %44 = arith.addf %43, %42 : vector<2x32xf32>
    %45 = arith.divf %43, %44 : vector<2x32xf32>
    %46 = vector.extract_strided_slice %39 {offsets = [0, 32], sizes = [2, 32], strides = [1, 1]} : vector<2x128xf32> to vector<2x32xf32>
    %47 = arith.negf %46 : vector<2x32xf32>
    %48 = math.exp %47 : vector<2x32xf32>
    %cst_15 = arith.constant 1.000000e+00 : f32
    %49 = vector.broadcast %cst_15 : f32 to vector<2x32xf32>
    %50 = arith.addf %49, %48 : vector<2x32xf32>
    %51 = arith.divf %49, %50 : vector<2x32xf32>
    %52 = vector.extract_strided_slice %39 {offsets = [0, 64], sizes = [2, 32], strides = [1, 1]} : vector<2x128xf32> to vector<2x32xf32>
    %53 = math.tanh %52 : vector<2x32xf32>
    %54 = vector.extract_strided_slice %39 {offsets = [0, 96], sizes = [2, 32], strides = [1, 1]} : vector<2x128xf32> to vector<2x32xf32>
    %55 = arith.negf %54 : vector<2x32xf32>
    %56 = math.exp %55 : vector<2x32xf32>
    %cst_16 = arith.constant 1.000000e+00 : f32
    %57 = vector.broadcast %cst_16 : f32 to vector<2x32xf32>
    %58 = arith.addf %57, %56 : vector<2x32xf32>
    %59 = arith.divf %57, %58 : vector<2x32xf32>
    %60 = arith.mulf %51, %34 : vector<2x32xf32>
    %61 = arith.mulf %45, %53 : vector<2x32xf32>
    %62 = arith.addf %60, %61 : vector<2x32xf32>
    %63 = math.tanh %62 : vector<2x32xf32>
    %64 = arith.mulf %59, %63 : vector<2x32xf32>
    %65 = vector.extract_strided_slice %6 {offsets = [4, 0], sizes = [2, 128], strides = [1, 1]} : vector<16x128xf32> to vector<2x128xf32>
    %cst_17 = arith.constant dense<0.000000e+00> : vector<2x128xf32>
    %66 = tpu.matmul %64, %2, %cst_17 {dimension_numbers = #tpu.dot_dimension_numbers<[1], [0], [0], [1], [0, 0, 1, 1], [], []>} : vector<2x32xf32>, vector<32x128xf32>, vector<2x128xf32> -> vector<2x128xf32>
    %67 = arith.addf %65, %66 : vector<2x128xf32>
    %68 = vector.extract_strided_slice %67 {offsets = [0, 0], sizes = [2, 32], strides = [1, 1]} : vector<2x128xf32> to vector<2x32xf32>
    %69 = arith.negf %68 : vector<2x32xf32>
    %70 = math.exp %69 : vector<2x32xf32>
    %cst_18 = arith.constant 1.000000e+00 : f32
    %71 = vector.broadcast %cst_18 : f32 to vector<2x32xf32>
    %72 = arith.addf %71, %70 : vector<2x32xf32>
    %73 = arith.divf %71, %72 : vector<2x32xf32>
    %74 = vector.extract_strided_slice %67 {offsets = [0, 32], sizes = [2, 32], strides = [1, 1]} : vector<2x128xf32> to vector<2x32xf32>
    %75 = arith.negf %74 : vector<2x32xf32>
    %76 = math.exp %75 : vector<2x32xf32>
    %cst_19 = arith.constant 1.000000e+00 : f32
    %77 = vector.broadcast %cst_19 : f32 to vector<2x32xf32>
    %78 = arith.addf %77, %76 : vector<2x32xf32>
    %79 = arith.divf %77, %78 : vector<2x32xf32>
    %80 = vector.extract_strided_slice %67 {offsets = [0, 64], sizes = [2, 32], strides = [1, 1]} : vector<2x128xf32> to vector<2x32xf32>
    %81 = math.tanh %80 : vector<2x32xf32>
    %82 = vector.extract_strided_slice %67 {offsets = [0, 96], sizes = [2, 32], strides = [1, 1]} : vector<2x128xf32> to vector<2x32xf32>
    %83 = arith.negf %82 : vector<2x32xf32>
    %84 = math.exp %83 : vector<2x32xf32>
    %cst_20 = arith.constant 1.000000e+00 : f32
    %85 = vector.broadcast %cst_20 : f32 to vector<2x32xf32>
    %86 = arith.addf %85, %84 : vector<2x32xf32>
    %87 = arith.divf %85, %86 : vector<2x32xf32>
    %88 = arith.mulf %79, %62 : vector<2x32xf32>
    %89 = arith.mulf %73, %81 : vector<2x32xf32>
    %90 = arith.addf %88, %89 : vector<2x32xf32>
    %91 = math.tanh %90 : vector<2x32xf32>
    %92 = arith.mulf %87, %91 : vector<2x32xf32>
    %93 = vector.extract_strided_slice %6 {offsets = [6, 0], sizes = [2, 128], strides = [1, 1]} : vector<16x128xf32> to vector<2x128xf32>
    %cst_21 = arith.constant dense<0.000000e+00> : vector<2x128xf32>
    %94 = tpu.matmul %92, %2, %cst_21 {dimension_numbers = #tpu.dot_dimension_numbers<[1], [0], [0], [1], [0, 0, 1, 1], [], []>} : vector<2x32xf32>, vector<32x128xf32>, vector<2x128xf32> -> vector<2x128xf32>
    %95 = arith.addf %93, %94 : vector<2x128xf32>
    %96 = vector.extract_strided_slice %95 {offsets = [0, 0], sizes = [2, 32], strides = [1, 1]} : vector<2x128xf32> to vector<2x32xf32>
    %97 = arith.negf %96 : vector<2x32xf32>
    %98 = math.exp %97 : vector<2x32xf32>
    %cst_22 = arith.constant 1.000000e+00 : f32
    %99 = vector.broadcast %cst_22 : f32 to vector<2x32xf32>
    %100 = arith.addf %99, %98 : vector<2x32xf32>
    %101 = arith.divf %99, %100 : vector<2x32xf32>
    %102 = vector.extract_strided_slice %95 {offsets = [0, 32], sizes = [2, 32], strides = [1, 1]} : vector<2x128xf32> to vector<2x32xf32>
    %103 = arith.negf %102 : vector<2x32xf32>
    %104 = math.exp %103 : vector<2x32xf32>
    %cst_23 = arith.constant 1.000000e+00 : f32
    %105 = vector.broadcast %cst_23 : f32 to vector<2x32xf32>
    %106 = arith.addf %105, %104 : vector<2x32xf32>
    %107 = arith.divf %105, %106 : vector<2x32xf32>
    %108 = vector.extract_strided_slice %95 {offsets = [0, 64], sizes = [2, 32], strides = [1, 1]} : vector<2x128xf32> to vector<2x32xf32>
    %109 = math.tanh %108 : vector<2x32xf32>
    %110 = vector.extract_strided_slice %95 {offsets = [0, 96], sizes = [2, 32], strides = [1, 1]} : vector<2x128xf32> to vector<2x32xf32>
    %111 = arith.negf %110 : vector<2x32xf32>
    %112 = math.exp %111 : vector<2x32xf32>
    %cst_24 = arith.constant 1.000000e+00 : f32
    %113 = vector.broadcast %cst_24 : f32 to vector<2x32xf32>
    %114 = arith.addf %113, %112 : vector<2x32xf32>
    %115 = arith.divf %113, %114 : vector<2x32xf32>
    %116 = arith.mulf %107, %90 : vector<2x32xf32>
    %117 = arith.mulf %101, %109 : vector<2x32xf32>
    %118 = arith.addf %116, %117 : vector<2x32xf32>
    %119 = math.tanh %118 : vector<2x32xf32>
    %120 = arith.mulf %115, %119 : vector<2x32xf32>
    %121 = vector.extract_strided_slice %6 {offsets = [8, 0], sizes = [2, 128], strides = [1, 1]} : vector<16x128xf32> to vector<2x128xf32>
    %cst_25 = arith.constant dense<0.000000e+00> : vector<2x128xf32>
    %122 = tpu.matmul %120, %2, %cst_25 {dimension_numbers = #tpu.dot_dimension_numbers<[1], [0], [0], [1], [0, 0, 1, 1], [], []>} : vector<2x32xf32>, vector<32x128xf32>, vector<2x128xf32> -> vector<2x128xf32>
    %123 = arith.addf %121, %122 : vector<2x128xf32>
    %124 = vector.extract_strided_slice %123 {offsets = [0, 0], sizes = [2, 32], strides = [1, 1]} : vector<2x128xf32> to vector<2x32xf32>
    %125 = arith.negf %124 : vector<2x32xf32>
    %126 = math.exp %125 : vector<2x32xf32>
    %cst_26 = arith.constant 1.000000e+00 : f32
    %127 = vector.broadcast %cst_26 : f32 to vector<2x32xf32>
    %128 = arith.addf %127, %126 : vector<2x32xf32>
    %129 = arith.divf %127, %128 : vector<2x32xf32>
    %130 = vector.extract_strided_slice %123 {offsets = [0, 32], sizes = [2, 32], strides = [1, 1]} : vector<2x128xf32> to vector<2x32xf32>
    %131 = arith.negf %130 : vector<2x32xf32>
    %132 = math.exp %131 : vector<2x32xf32>
    %cst_27 = arith.constant 1.000000e+00 : f32
    %133 = vector.broadcast %cst_27 : f32 to vector<2x32xf32>
    %134 = arith.addf %133, %132 : vector<2x32xf32>
    %135 = arith.divf %133, %134 : vector<2x32xf32>
    %136 = vector.extract_strided_slice %123 {offsets = [0, 64], sizes = [2, 32], strides = [1, 1]} : vector<2x128xf32> to vector<2x32xf32>
    %137 = math.tanh %136 : vector<2x32xf32>
    %138 = vector.extract_strided_slice %123 {offsets = [0, 96], sizes = [2, 32], strides = [1, 1]} : vector<2x128xf32> to vector<2x32xf32>
    %139 = arith.negf %138 : vector<2x32xf32>
    %140 = math.exp %139 : vector<2x32xf32>
    %cst_28 = arith.constant 1.000000e+00 : f32
    %141 = vector.broadcast %cst_28 : f32 to vector<2x32xf32>
    %142 = arith.addf %141, %140 : vector<2x32xf32>
    %143 = arith.divf %141, %142 : vector<2x32xf32>
    %144 = arith.mulf %135, %118 : vector<2x32xf32>
    %145 = arith.mulf %129, %137 : vector<2x32xf32>
    %146 = arith.addf %144, %145 : vector<2x32xf32>
    %147 = math.tanh %146 : vector<2x32xf32>
    %148 = arith.mulf %143, %147 : vector<2x32xf32>
    %149 = vector.extract_strided_slice %6 {offsets = [10, 0], sizes = [2, 128], strides = [1, 1]} : vector<16x128xf32> to vector<2x128xf32>
    %cst_29 = arith.constant dense<0.000000e+00> : vector<2x128xf32>
    %150 = tpu.matmul %148, %2, %cst_29 {dimension_numbers = #tpu.dot_dimension_numbers<[1], [0], [0], [1], [0, 0, 1, 1], [], []>} : vector<2x32xf32>, vector<32x128xf32>, vector<2x128xf32> -> vector<2x128xf32>
    %151 = arith.addf %149, %150 : vector<2x128xf32>
    %152 = vector.extract_strided_slice %151 {offsets = [0, 0], sizes = [2, 32], strides = [1, 1]} : vector<2x128xf32> to vector<2x32xf32>
    %153 = arith.negf %152 : vector<2x32xf32>
    %154 = math.exp %153 : vector<2x32xf32>
    %cst_30 = arith.constant 1.000000e+00 : f32
    %155 = vector.broadcast %cst_30 : f32 to vector<2x32xf32>
    %156 = arith.addf %155, %154 : vector<2x32xf32>
    %157 = arith.divf %155, %156 : vector<2x32xf32>
    %158 = vector.extract_strided_slice %151 {offsets = [0, 32], sizes = [2, 32], strides = [1, 1]} : vector<2x128xf32> to vector<2x32xf32>
    %159 = arith.negf %158 : vector<2x32xf32>
    %160 = math.exp %159 : vector<2x32xf32>
    %cst_31 = arith.constant 1.000000e+00 : f32
    %161 = vector.broadcast %cst_31 : f32 to vector<2x32xf32>
    %162 = arith.addf %161, %160 : vector<2x32xf32>
    %163 = arith.divf %161, %162 : vector<2x32xf32>
    %164 = vector.extract_strided_slice %151 {offsets = [0, 64], sizes = [2, 32], strides = [1, 1]} : vector<2x128xf32> to vector<2x32xf32>
    %165 = math.tanh %164 : vector<2x32xf32>
    %166 = vector.extract_strided_slice %151 {offsets = [0, 96], sizes = [2, 32], strides = [1, 1]} : vector<2x128xf32> to vector<2x32xf32>
    %167 = arith.negf %166 : vector<2x32xf32>
    %168 = math.exp %167 : vector<2x32xf32>
    %cst_32 = arith.constant 1.000000e+00 : f32
    %169 = vector.broadcast %cst_32 : f32 to vector<2x32xf32>
    %170 = arith.addf %169, %168 : vector<2x32xf32>
    %171 = arith.divf %169, %170 : vector<2x32xf32>
    %172 = arith.mulf %163, %146 : vector<2x32xf32>
    %173 = arith.mulf %157, %165 : vector<2x32xf32>
    %174 = arith.addf %172, %173 : vector<2x32xf32>
    %175 = math.tanh %174 : vector<2x32xf32>
    %176 = arith.mulf %171, %175 : vector<2x32xf32>
    %177 = vector.extract_strided_slice %6 {offsets = [12, 0], sizes = [2, 128], strides = [1, 1]} : vector<16x128xf32> to vector<2x128xf32>
    %cst_33 = arith.constant dense<0.000000e+00> : vector<2x128xf32>
    %178 = tpu.matmul %176, %2, %cst_33 {dimension_numbers = #tpu.dot_dimension_numbers<[1], [0], [0], [1], [0, 0, 1, 1], [], []>} : vector<2x32xf32>, vector<32x128xf32>, vector<2x128xf32> -> vector<2x128xf32>
    %179 = arith.addf %177, %178 : vector<2x128xf32>
    %180 = vector.extract_strided_slice %179 {offsets = [0, 0], sizes = [2, 32], strides = [1, 1]} : vector<2x128xf32> to vector<2x32xf32>
    %181 = arith.negf %180 : vector<2x32xf32>
    %182 = math.exp %181 : vector<2x32xf32>
    %cst_34 = arith.constant 1.000000e+00 : f32
    %183 = vector.broadcast %cst_34 : f32 to vector<2x32xf32>
    %184 = arith.addf %183, %182 : vector<2x32xf32>
    %185 = arith.divf %183, %184 : vector<2x32xf32>
    %186 = vector.extract_strided_slice %179 {offsets = [0, 32], sizes = [2, 32], strides = [1, 1]} : vector<2x128xf32> to vector<2x32xf32>
    %187 = arith.negf %186 : vector<2x32xf32>
    %188 = math.exp %187 : vector<2x32xf32>
    %cst_35 = arith.constant 1.000000e+00 : f32
    %189 = vector.broadcast %cst_35 : f32 to vector<2x32xf32>
    %190 = arith.addf %189, %188 : vector<2x32xf32>
    %191 = arith.divf %189, %190 : vector<2x32xf32>
    %192 = vector.extract_strided_slice %179 {offsets = [0, 64], sizes = [2, 32], strides = [1, 1]} : vector<2x128xf32> to vector<2x32xf32>
    %193 = math.tanh %192 : vector<2x32xf32>
    %194 = vector.extract_strided_slice %179 {offsets = [0, 96], sizes = [2, 32], strides = [1, 1]} : vector<2x128xf32> to vector<2x32xf32>
    %195 = arith.negf %194 : vector<2x32xf32>
    %196 = math.exp %195 : vector<2x32xf32>
    %cst_36 = arith.constant 1.000000e+00 : f32
    %197 = vector.broadcast %cst_36 : f32 to vector<2x32xf32>
    %198 = arith.addf %197, %196 : vector<2x32xf32>
    %199 = arith.divf %197, %198 : vector<2x32xf32>
    %200 = arith.mulf %191, %174 : vector<2x32xf32>
    %201 = arith.mulf %185, %193 : vector<2x32xf32>
    %202 = arith.addf %200, %201 : vector<2x32xf32>
    %203 = math.tanh %202 : vector<2x32xf32>
    %204 = arith.mulf %199, %203 : vector<2x32xf32>
    %205 = vector.extract_strided_slice %6 {offsets = [14, 0], sizes = [2, 128], strides = [1, 1]} : vector<16x128xf32> to vector<2x128xf32>
    %cst_37 = arith.constant dense<0.000000e+00> : vector<2x128xf32>
    %206 = tpu.matmul %204, %2, %cst_37 {dimension_numbers = #tpu.dot_dimension_numbers<[1], [0], [0], [1], [0, 0, 1, 1], [], []>} : vector<2x32xf32>, vector<32x128xf32>, vector<2x128xf32> -> vector<2x128xf32>
    %207 = arith.addf %205, %206 : vector<2x128xf32>
    %208 = vector.extract_strided_slice %207 {offsets = [0, 0], sizes = [2, 32], strides = [1, 1]} : vector<2x128xf32> to vector<2x32xf32>
    %209 = arith.negf %208 : vector<2x32xf32>
    %210 = math.exp %209 : vector<2x32xf32>
    %cst_38 = arith.constant 1.000000e+00 : f32
    %211 = vector.broadcast %cst_38 : f32 to vector<2x32xf32>
    %212 = arith.addf %211, %210 : vector<2x32xf32>
    %213 = arith.divf %211, %212 : vector<2x32xf32>
    %214 = vector.extract_strided_slice %207 {offsets = [0, 32], sizes = [2, 32], strides = [1, 1]} : vector<2x128xf32> to vector<2x32xf32>
    %215 = arith.negf %214 : vector<2x32xf32>
    %216 = math.exp %215 : vector<2x32xf32>
    %cst_39 = arith.constant 1.000000e+00 : f32
    %217 = vector.broadcast %cst_39 : f32 to vector<2x32xf32>
    %218 = arith.addf %217, %216 : vector<2x32xf32>
    %219 = arith.divf %217, %218 : vector<2x32xf32>
    %220 = vector.extract_strided_slice %207 {offsets = [0, 64], sizes = [2, 32], strides = [1, 1]} : vector<2x128xf32> to vector<2x32xf32>
    %221 = math.tanh %220 : vector<2x32xf32>
    %222 = vector.extract_strided_slice %207 {offsets = [0, 96], sizes = [2, 32], strides = [1, 1]} : vector<2x128xf32> to vector<2x32xf32>
    %223 = arith.negf %222 : vector<2x32xf32>
    %224 = math.exp %223 : vector<2x32xf32>
    %cst_40 = arith.constant 1.000000e+00 : f32
    %225 = vector.broadcast %cst_40 : f32 to vector<2x32xf32>
    %226 = arith.addf %225, %224 : vector<2x32xf32>
    %227 = arith.divf %225, %226 : vector<2x32xf32>
    %228 = arith.mulf %219, %202 : vector<2x32xf32>
    %229 = arith.mulf %213, %221 : vector<2x32xf32>
    %230 = arith.addf %228, %229 : vector<2x32xf32>
    %231 = math.tanh %230 : vector<2x32xf32>
    %232 = arith.mulf %227, %231 : vector<2x32xf32>
    %233 = tpu.concatenate %36, %64, %92, %120, %148, %176, %204, %232 in 0 : vector<2x32xf32>, vector<2x32xf32>, vector<2x32xf32>, vector<2x32xf32>, vector<2x32xf32>, vector<2x32xf32>, vector<2x32xf32>, vector<2x32xf32> -> vector<16x32xf32>
    %c0_41 = arith.constant 0 : index
    %c0_42 = arith.constant 0 : index
    %234 = vector.load %arg4[%c0_41, %c0_42] : memref<32x128xf32, #tpu.memory_space<vmem>>, vector<32x128xf32>
    %c0_43 = arith.constant 0 : index
    %c0_44 = arith.constant 0 : index
    %235 = vector.load %arg5[%c0_43, %c0_44] : memref<32x128xf32, #tpu.memory_space<vmem>>, vector<32x128xf32>
    %c0_45 = arith.constant 0 : index
    %c0_46 = arith.constant 0 : index
    %236 = vector.load %arg6[%c0_45, %c0_46] : memref<1x128xf32, #tpu.memory_space<vmem>>, vector<1x128xf32>
    %cst_47 = arith.constant dense<0.000000e+00> : vector<16x128xf32>
    %237 = tpu.matmul %233, %234, %cst_47 {dimension_numbers = #tpu.dot_dimension_numbers<[1], [0], [0], [1], [0, 0, 1, 1], [], []>} : vector<16x32xf32>, vector<32x128xf32>, vector<16x128xf32> -> vector<16x128xf32>
    %238 = vector.broadcast %236 : vector<1x128xf32> to vector<16x128xf32>
    %239 = arith.addf %237, %238 : vector<16x128xf32>
    %cst_48 = arith.constant 0.000000e+00 : f32
    %240 = vector.broadcast %cst_48 : f32 to vector<2x32xf32>
    %cst_49 = arith.constant 0.000000e+00 : f32
    %241 = vector.broadcast %cst_49 : f32 to vector<2x32xf32>
    %242 = vector.extract_strided_slice %239 {offsets = [0, 0], sizes = [2, 128], strides = [1, 1]} : vector<16x128xf32> to vector<2x128xf32>
    %cst_50 = arith.constant dense<0.000000e+00> : vector<2x128xf32>
    %243 = tpu.matmul %240, %235, %cst_50 {dimension_numbers = #tpu.dot_dimension_numbers<[1], [0], [0], [1], [0, 0, 1, 1], [], []>} : vector<2x32xf32>, vector<32x128xf32>, vector<2x128xf32> -> vector<2x128xf32>
    %244 = arith.addf %242, %243 : vector<2x128xf32>
    %245 = vector.extract_strided_slice %244 {offsets = [0, 0], sizes = [2, 32], strides = [1, 1]} : vector<2x128xf32> to vector<2x32xf32>
    %246 = arith.negf %245 : vector<2x32xf32>
    %247 = math.exp %246 : vector<2x32xf32>
    %cst_51 = arith.constant 1.000000e+00 : f32
    %248 = vector.broadcast %cst_51 : f32 to vector<2x32xf32>
    %249 = arith.addf %248, %247 : vector<2x32xf32>
    %250 = arith.divf %248, %249 : vector<2x32xf32>
    %251 = vector.extract_strided_slice %244 {offsets = [0, 32], sizes = [2, 32], strides = [1, 1]} : vector<2x128xf32> to vector<2x32xf32>
    %252 = arith.negf %251 : vector<2x32xf32>
    %253 = math.exp %252 : vector<2x32xf32>
    %cst_52 = arith.constant 1.000000e+00 : f32
    %254 = vector.broadcast %cst_52 : f32 to vector<2x32xf32>
    %255 = arith.addf %254, %253 : vector<2x32xf32>
    %256 = arith.divf %254, %255 : vector<2x32xf32>
    %257 = vector.extract_strided_slice %244 {offsets = [0, 64], sizes = [2, 32], strides = [1, 1]} : vector<2x128xf32> to vector<2x32xf32>
    %258 = math.tanh %257 : vector<2x32xf32>
    %259 = vector.extract_strided_slice %244 {offsets = [0, 96], sizes = [2, 32], strides = [1, 1]} : vector<2x128xf32> to vector<2x32xf32>
    %260 = arith.negf %259 : vector<2x32xf32>
    %261 = math.exp %260 : vector<2x32xf32>
    %cst_53 = arith.constant 1.000000e+00 : f32
    %262 = vector.broadcast %cst_53 : f32 to vector<2x32xf32>
    %263 = arith.addf %262, %261 : vector<2x32xf32>
    %264 = arith.divf %262, %263 : vector<2x32xf32>
    %265 = arith.mulf %256, %241 : vector<2x32xf32>
    %266 = arith.mulf %250, %258 : vector<2x32xf32>
    %267 = arith.addf %265, %266 : vector<2x32xf32>
    %268 = math.tanh %267 : vector<2x32xf32>
    %269 = arith.mulf %264, %268 : vector<2x32xf32>
    %270 = vector.extract_strided_slice %239 {offsets = [2, 0], sizes = [2, 128], strides = [1, 1]} : vector<16x128xf32> to vector<2x128xf32>
    %cst_54 = arith.constant dense<0.000000e+00> : vector<2x128xf32>
    %271 = tpu.matmul %269, %235, %cst_54 {dimension_numbers = #tpu.dot_dimension_numbers<[1], [0], [0], [1], [0, 0, 1, 1], [], []>} : vector<2x32xf32>, vector<32x128xf32>, vector<2x128xf32> -> vector<2x128xf32>
    %272 = arith.addf %270, %271 : vector<2x128xf32>
    %273 = vector.extract_strided_slice %272 {offsets = [0, 0], sizes = [2, 32], strides = [1, 1]} : vector<2x128xf32> to vector<2x32xf32>
    %274 = arith.negf %273 : vector<2x32xf32>
    %275 = math.exp %274 : vector<2x32xf32>
    %cst_55 = arith.constant 1.000000e+00 : f32
    %276 = vector.broadcast %cst_55 : f32 to vector<2x32xf32>
    %277 = arith.addf %276, %275 : vector<2x32xf32>
    %278 = arith.divf %276, %277 : vector<2x32xf32>
    %279 = vector.extract_strided_slice %272 {offsets = [0, 32], sizes = [2, 32], strides = [1, 1]} : vector<2x128xf32> to vector<2x32xf32>
    %280 = arith.negf %279 : vector<2x32xf32>
    %281 = math.exp %280 : vector<2x32xf32>
    %cst_56 = arith.constant 1.000000e+00 : f32
    %282 = vector.broadcast %cst_56 : f32 to vector<2x32xf32>
    %283 = arith.addf %282, %281 : vector<2x32xf32>
    %284 = arith.divf %282, %283 : vector<2x32xf32>
    %285 = vector.extract_strided_slice %272 {offsets = [0, 64], sizes = [2, 32], strides = [1, 1]} : vector<2x128xf32> to vector<2x32xf32>
    %286 = math.tanh %285 : vector<2x32xf32>
    %287 = vector.extract_strided_slice %272 {offsets = [0, 96], sizes = [2, 32], strides = [1, 1]} : vector<2x128xf32> to vector<2x32xf32>
    %288 = arith.negf %287 : vector<2x32xf32>
    %289 = math.exp %288 : vector<2x32xf32>
    %cst_57 = arith.constant 1.000000e+00 : f32
    %290 = vector.broadcast %cst_57 : f32 to vector<2x32xf32>
    %291 = arith.addf %290, %289 : vector<2x32xf32>
    %292 = arith.divf %290, %291 : vector<2x32xf32>
    %293 = arith.mulf %284, %267 : vector<2x32xf32>
    %294 = arith.mulf %278, %286 : vector<2x32xf32>
    %295 = arith.addf %293, %294 : vector<2x32xf32>
    %296 = math.tanh %295 : vector<2x32xf32>
    %297 = arith.mulf %292, %296 : vector<2x32xf32>
    %298 = vector.extract_strided_slice %239 {offsets = [4, 0], sizes = [2, 128], strides = [1, 1]} : vector<16x128xf32> to vector<2x128xf32>
    %cst_58 = arith.constant dense<0.000000e+00> : vector<2x128xf32>
    %299 = tpu.matmul %297, %235, %cst_58 {dimension_numbers = #tpu.dot_dimension_numbers<[1], [0], [0], [1], [0, 0, 1, 1], [], []>} : vector<2x32xf32>, vector<32x128xf32>, vector<2x128xf32> -> vector<2x128xf32>
    %300 = arith.addf %298, %299 : vector<2x128xf32>
    %301 = vector.extract_strided_slice %300 {offsets = [0, 0], sizes = [2, 32], strides = [1, 1]} : vector<2x128xf32> to vector<2x32xf32>
    %302 = arith.negf %301 : vector<2x32xf32>
    %303 = math.exp %302 : vector<2x32xf32>
    %cst_59 = arith.constant 1.000000e+00 : f32
    %304 = vector.broadcast %cst_59 : f32 to vector<2x32xf32>
    %305 = arith.addf %304, %303 : vector<2x32xf32>
    %306 = arith.divf %304, %305 : vector<2x32xf32>
    %307 = vector.extract_strided_slice %300 {offsets = [0, 32], sizes = [2, 32], strides = [1, 1]} : vector<2x128xf32> to vector<2x32xf32>
    %308 = arith.negf %307 : vector<2x32xf32>
    %309 = math.exp %308 : vector<2x32xf32>
    %cst_60 = arith.constant 1.000000e+00 : f32
    %310 = vector.broadcast %cst_60 : f32 to vector<2x32xf32>
    %311 = arith.addf %310, %309 : vector<2x32xf32>
    %312 = arith.divf %310, %311 : vector<2x32xf32>
    %313 = vector.extract_strided_slice %300 {offsets = [0, 64], sizes = [2, 32], strides = [1, 1]} : vector<2x128xf32> to vector<2x32xf32>
    %314 = math.tanh %313 : vector<2x32xf32>
    %315 = vector.extract_strided_slice %300 {offsets = [0, 96], sizes = [2, 32], strides = [1, 1]} : vector<2x128xf32> to vector<2x32xf32>
    %316 = arith.negf %315 : vector<2x32xf32>
    %317 = math.exp %316 : vector<2x32xf32>
    %cst_61 = arith.constant 1.000000e+00 : f32
    %318 = vector.broadcast %cst_61 : f32 to vector<2x32xf32>
    %319 = arith.addf %318, %317 : vector<2x32xf32>
    %320 = arith.divf %318, %319 : vector<2x32xf32>
    %321 = arith.mulf %312, %295 : vector<2x32xf32>
    %322 = arith.mulf %306, %314 : vector<2x32xf32>
    %323 = arith.addf %321, %322 : vector<2x32xf32>
    %324 = math.tanh %323 : vector<2x32xf32>
    %325 = arith.mulf %320, %324 : vector<2x32xf32>
    %326 = vector.extract_strided_slice %239 {offsets = [6, 0], sizes = [2, 128], strides = [1, 1]} : vector<16x128xf32> to vector<2x128xf32>
    %cst_62 = arith.constant dense<0.000000e+00> : vector<2x128xf32>
    %327 = tpu.matmul %325, %235, %cst_62 {dimension_numbers = #tpu.dot_dimension_numbers<[1], [0], [0], [1], [0, 0, 1, 1], [], []>} : vector<2x32xf32>, vector<32x128xf32>, vector<2x128xf32> -> vector<2x128xf32>
    %328 = arith.addf %326, %327 : vector<2x128xf32>
    %329 = vector.extract_strided_slice %328 {offsets = [0, 0], sizes = [2, 32], strides = [1, 1]} : vector<2x128xf32> to vector<2x32xf32>
    %330 = arith.negf %329 : vector<2x32xf32>
    %331 = math.exp %330 : vector<2x32xf32>
    %cst_63 = arith.constant 1.000000e+00 : f32
    %332 = vector.broadcast %cst_63 : f32 to vector<2x32xf32>
    %333 = arith.addf %332, %331 : vector<2x32xf32>
    %334 = arith.divf %332, %333 : vector<2x32xf32>
    %335 = vector.extract_strided_slice %328 {offsets = [0, 32], sizes = [2, 32], strides = [1, 1]} : vector<2x128xf32> to vector<2x32xf32>
    %336 = arith.negf %335 : vector<2x32xf32>
    %337 = math.exp %336 : vector<2x32xf32>
    %cst_64 = arith.constant 1.000000e+00 : f32
    %338 = vector.broadcast %cst_64 : f32 to vector<2x32xf32>
    %339 = arith.addf %338, %337 : vector<2x32xf32>
    %340 = arith.divf %338, %339 : vector<2x32xf32>
    %341 = vector.extract_strided_slice %328 {offsets = [0, 64], sizes = [2, 32], strides = [1, 1]} : vector<2x128xf32> to vector<2x32xf32>
    %342 = math.tanh %341 : vector<2x32xf32>
    %343 = vector.extract_strided_slice %328 {offsets = [0, 96], sizes = [2, 32], strides = [1, 1]} : vector<2x128xf32> to vector<2x32xf32>
    %344 = arith.negf %343 : vector<2x32xf32>
    %345 = math.exp %344 : vector<2x32xf32>
    %cst_65 = arith.constant 1.000000e+00 : f32
    %346 = vector.broadcast %cst_65 : f32 to vector<2x32xf32>
    %347 = arith.addf %346, %345 : vector<2x32xf32>
    %348 = arith.divf %346, %347 : vector<2x32xf32>
    %349 = arith.mulf %340, %323 : vector<2x32xf32>
    %350 = arith.mulf %334, %342 : vector<2x32xf32>
    %351 = arith.addf %349, %350 : vector<2x32xf32>
    %352 = math.tanh %351 : vector<2x32xf32>
    %353 = arith.mulf %348, %352 : vector<2x32xf32>
    %354 = vector.extract_strided_slice %239 {offsets = [8, 0], sizes = [2, 128], strides = [1, 1]} : vector<16x128xf32> to vector<2x128xf32>
    %cst_66 = arith.constant dense<0.000000e+00> : vector<2x128xf32>
    %355 = tpu.matmul %353, %235, %cst_66 {dimension_numbers = #tpu.dot_dimension_numbers<[1], [0], [0], [1], [0, 0, 1, 1], [], []>} : vector<2x32xf32>, vector<32x128xf32>, vector<2x128xf32> -> vector<2x128xf32>
    %356 = arith.addf %354, %355 : vector<2x128xf32>
    %357 = vector.extract_strided_slice %356 {offsets = [0, 0], sizes = [2, 32], strides = [1, 1]} : vector<2x128xf32> to vector<2x32xf32>
    %358 = arith.negf %357 : vector<2x32xf32>
    %359 = math.exp %358 : vector<2x32xf32>
    %cst_67 = arith.constant 1.000000e+00 : f32
    %360 = vector.broadcast %cst_67 : f32 to vector<2x32xf32>
    %361 = arith.addf %360, %359 : vector<2x32xf32>
    %362 = arith.divf %360, %361 : vector<2x32xf32>
    %363 = vector.extract_strided_slice %356 {offsets = [0, 32], sizes = [2, 32], strides = [1, 1]} : vector<2x128xf32> to vector<2x32xf32>
    %364 = arith.negf %363 : vector<2x32xf32>
    %365 = math.exp %364 : vector<2x32xf32>
    %cst_68 = arith.constant 1.000000e+00 : f32
    %366 = vector.broadcast %cst_68 : f32 to vector<2x32xf32>
    %367 = arith.addf %366, %365 : vector<2x32xf32>
    %368 = arith.divf %366, %367 : vector<2x32xf32>
    %369 = vector.extract_strided_slice %356 {offsets = [0, 64], sizes = [2, 32], strides = [1, 1]} : vector<2x128xf32> to vector<2x32xf32>
    %370 = math.tanh %369 : vector<2x32xf32>
    %371 = vector.extract_strided_slice %356 {offsets = [0, 96], sizes = [2, 32], strides = [1, 1]} : vector<2x128xf32> to vector<2x32xf32>
    %372 = arith.negf %371 : vector<2x32xf32>
    %373 = math.exp %372 : vector<2x32xf32>
    %cst_69 = arith.constant 1.000000e+00 : f32
    %374 = vector.broadcast %cst_69 : f32 to vector<2x32xf32>
    %375 = arith.addf %374, %373 : vector<2x32xf32>
    %376 = arith.divf %374, %375 : vector<2x32xf32>
    %377 = arith.mulf %368, %351 : vector<2x32xf32>
    %378 = arith.mulf %362, %370 : vector<2x32xf32>
    %379 = arith.addf %377, %378 : vector<2x32xf32>
    %380 = math.tanh %379 : vector<2x32xf32>
    %381 = arith.mulf %376, %380 : vector<2x32xf32>
    %382 = vector.extract_strided_slice %239 {offsets = [10, 0], sizes = [2, 128], strides = [1, 1]} : vector<16x128xf32> to vector<2x128xf32>
    %cst_70 = arith.constant dense<0.000000e+00> : vector<2x128xf32>
    %383 = tpu.matmul %381, %235, %cst_70 {dimension_numbers = #tpu.dot_dimension_numbers<[1], [0], [0], [1], [0, 0, 1, 1], [], []>} : vector<2x32xf32>, vector<32x128xf32>, vector<2x128xf32> -> vector<2x128xf32>
    %384 = arith.addf %382, %383 : vector<2x128xf32>
    %385 = vector.extract_strided_slice %384 {offsets = [0, 0], sizes = [2, 32], strides = [1, 1]} : vector<2x128xf32> to vector<2x32xf32>
    %386 = arith.negf %385 : vector<2x32xf32>
    %387 = math.exp %386 : vector<2x32xf32>
    %cst_71 = arith.constant 1.000000e+00 : f32
    %388 = vector.broadcast %cst_71 : f32 to vector<2x32xf32>
    %389 = arith.addf %388, %387 : vector<2x32xf32>
    %390 = arith.divf %388, %389 : vector<2x32xf32>
    %391 = vector.extract_strided_slice %384 {offsets = [0, 32], sizes = [2, 32], strides = [1, 1]} : vector<2x128xf32> to vector<2x32xf32>
    %392 = arith.negf %391 : vector<2x32xf32>
    %393 = math.exp %392 : vector<2x32xf32>
    %cst_72 = arith.constant 1.000000e+00 : f32
    %394 = vector.broadcast %cst_72 : f32 to vector<2x32xf32>
    %395 = arith.addf %394, %393 : vector<2x32xf32>
    %396 = arith.divf %394, %395 : vector<2x32xf32>
    %397 = vector.extract_strided_slice %384 {offsets = [0, 64], sizes = [2, 32], strides = [1, 1]} : vector<2x128xf32> to vector<2x32xf32>
    %398 = math.tanh %397 : vector<2x32xf32>
    %399 = vector.extract_strided_slice %384 {offsets = [0, 96], sizes = [2, 32], strides = [1, 1]} : vector<2x128xf32> to vector<2x32xf32>
    %400 = arith.negf %399 : vector<2x32xf32>
    %401 = math.exp %400 : vector<2x32xf32>
    %cst_73 = arith.constant 1.000000e+00 : f32
    %402 = vector.broadcast %cst_73 : f32 to vector<2x32xf32>
    %403 = arith.addf %402, %401 : vector<2x32xf32>
    %404 = arith.divf %402, %403 : vector<2x32xf32>
    %405 = arith.mulf %396, %379 : vector<2x32xf32>
    %406 = arith.mulf %390, %398 : vector<2x32xf32>
    %407 = arith.addf %405, %406 : vector<2x32xf32>
    %408 = math.tanh %407 : vector<2x32xf32>
    %409 = arith.mulf %404, %408 : vector<2x32xf32>
    %410 = vector.extract_strided_slice %239 {offsets = [12, 0], sizes = [2, 128], strides = [1, 1]} : vector<16x128xf32> to vector<2x128xf32>
    %cst_74 = arith.constant dense<0.000000e+00> : vector<2x128xf32>
    %411 = tpu.matmul %409, %235, %cst_74 {dimension_numbers = #tpu.dot_dimension_numbers<[1], [0], [0], [1], [0, 0, 1, 1], [], []>} : vector<2x32xf32>, vector<32x128xf32>, vector<2x128xf32> -> vector<2x128xf32>
    %412 = arith.addf %410, %411 : vector<2x128xf32>
    %413 = vector.extract_strided_slice %412 {offsets = [0, 0], sizes = [2, 32], strides = [1, 1]} : vector<2x128xf32> to vector<2x32xf32>
    %414 = arith.negf %413 : vector<2x32xf32>
    %415 = math.exp %414 : vector<2x32xf32>
    %cst_75 = arith.constant 1.000000e+00 : f32
    %416 = vector.broadcast %cst_75 : f32 to vector<2x32xf32>
    %417 = arith.addf %416, %415 : vector<2x32xf32>
    %418 = arith.divf %416, %417 : vector<2x32xf32>
    %419 = vector.extract_strided_slice %412 {offsets = [0, 32], sizes = [2, 32], strides = [1, 1]} : vector<2x128xf32> to vector<2x32xf32>
    %420 = arith.negf %419 : vector<2x32xf32>
    %421 = math.exp %420 : vector<2x32xf32>
    %cst_76 = arith.constant 1.000000e+00 : f32
    %422 = vector.broadcast %cst_76 : f32 to vector<2x32xf32>
    %423 = arith.addf %422, %421 : vector<2x32xf32>
    %424 = arith.divf %422, %423 : vector<2x32xf32>
    %425 = vector.extract_strided_slice %412 {offsets = [0, 64], sizes = [2, 32], strides = [1, 1]} : vector<2x128xf32> to vector<2x32xf32>
    %426 = math.tanh %425 : vector<2x32xf32>
    %427 = vector.extract_strided_slice %412 {offsets = [0, 96], sizes = [2, 32], strides = [1, 1]} : vector<2x128xf32> to vector<2x32xf32>
    %428 = arith.negf %427 : vector<2x32xf32>
    %429 = math.exp %428 : vector<2x32xf32>
    %cst_77 = arith.constant 1.000000e+00 : f32
    %430 = vector.broadcast %cst_77 : f32 to vector<2x32xf32>
    %431 = arith.addf %430, %429 : vector<2x32xf32>
    %432 = arith.divf %430, %431 : vector<2x32xf32>
    %433 = arith.mulf %424, %407 : vector<2x32xf32>
    %434 = arith.mulf %418, %426 : vector<2x32xf32>
    %435 = arith.addf %433, %434 : vector<2x32xf32>
    %436 = math.tanh %435 : vector<2x32xf32>
    %437 = arith.mulf %432, %436 : vector<2x32xf32>
    %438 = vector.extract_strided_slice %239 {offsets = [14, 0], sizes = [2, 128], strides = [1, 1]} : vector<16x128xf32> to vector<2x128xf32>
    %cst_78 = arith.constant dense<0.000000e+00> : vector<2x128xf32>
    %439 = tpu.matmul %437, %235, %cst_78 {dimension_numbers = #tpu.dot_dimension_numbers<[1], [0], [0], [1], [0, 0, 1, 1], [], []>} : vector<2x32xf32>, vector<32x128xf32>, vector<2x128xf32> -> vector<2x128xf32>
    %440 = arith.addf %438, %439 : vector<2x128xf32>
    %441 = vector.extract_strided_slice %440 {offsets = [0, 0], sizes = [2, 32], strides = [1, 1]} : vector<2x128xf32> to vector<2x32xf32>
    %442 = arith.negf %441 : vector<2x32xf32>
    %443 = math.exp %442 : vector<2x32xf32>
    %cst_79 = arith.constant 1.000000e+00 : f32
    %444 = vector.broadcast %cst_79 : f32 to vector<2x32xf32>
    %445 = arith.addf %444, %443 : vector<2x32xf32>
    %446 = arith.divf %444, %445 : vector<2x32xf32>
    %447 = vector.extract_strided_slice %440 {offsets = [0, 32], sizes = [2, 32], strides = [1, 1]} : vector<2x128xf32> to vector<2x32xf32>
    %448 = arith.negf %447 : vector<2x32xf32>
    %449 = math.exp %448 : vector<2x32xf32>
    %cst_80 = arith.constant 1.000000e+00 : f32
    %450 = vector.broadcast %cst_80 : f32 to vector<2x32xf32>
    %451 = arith.addf %450, %449 : vector<2x32xf32>
    %452 = arith.divf %450, %451 : vector<2x32xf32>
    %453 = vector.extract_strided_slice %440 {offsets = [0, 64], sizes = [2, 32], strides = [1, 1]} : vector<2x128xf32> to vector<2x32xf32>
    %454 = math.tanh %453 : vector<2x32xf32>
    %455 = vector.extract_strided_slice %440 {offsets = [0, 96], sizes = [2, 32], strides = [1, 1]} : vector<2x128xf32> to vector<2x32xf32>
    %456 = arith.negf %455 : vector<2x32xf32>
    %457 = math.exp %456 : vector<2x32xf32>
    %cst_81 = arith.constant 1.000000e+00 : f32
    %458 = vector.broadcast %cst_81 : f32 to vector<2x32xf32>
    %459 = arith.addf %458, %457 : vector<2x32xf32>
    %460 = arith.divf %458, %459 : vector<2x32xf32>
    %461 = arith.mulf %452, %435 : vector<2x32xf32>
    %462 = arith.mulf %446, %454 : vector<2x32xf32>
    %463 = arith.addf %461, %462 : vector<2x32xf32>
    %464 = math.tanh %463 : vector<2x32xf32>
    %465 = arith.mulf %460, %464 : vector<2x32xf32>
    %466 = tpu.concatenate %269, %297, %325, %353, %381, %409, %437, %465 in 0 : vector<2x32xf32>, vector<2x32xf32>, vector<2x32xf32>, vector<2x32xf32>, vector<2x32xf32>, vector<2x32xf32>, vector<2x32xf32>, vector<2x32xf32> -> vector<16x32xf32>
    %c0_82 = arith.constant 0 : index
    %c0_83 = arith.constant 0 : index
    %467 = vector.load %arg7[%c0_82, %c0_83] : memref<32x128xf32, #tpu.memory_space<vmem>>, vector<32x128xf32>
    %c0_84 = arith.constant 0 : index
    %c0_85 = arith.constant 0 : index
    %468 = vector.load %arg8[%c0_84, %c0_85] : memref<32x128xf32, #tpu.memory_space<vmem>>, vector<32x128xf32>
    %c0_86 = arith.constant 0 : index
    %c0_87 = arith.constant 0 : index
    %469 = vector.load %arg9[%c0_86, %c0_87] : memref<1x128xf32, #tpu.memory_space<vmem>>, vector<1x128xf32>
    %cst_88 = arith.constant dense<0.000000e+00> : vector<16x128xf32>
    %470 = tpu.matmul %466, %467, %cst_88 {dimension_numbers = #tpu.dot_dimension_numbers<[1], [0], [0], [1], [0, 0, 1, 1], [], []>} : vector<16x32xf32>, vector<32x128xf32>, vector<16x128xf32> -> vector<16x128xf32>
    %471 = vector.broadcast %469 : vector<1x128xf32> to vector<16x128xf32>
    %472 = arith.addf %470, %471 : vector<16x128xf32>
    %cst_89 = arith.constant 0.000000e+00 : f32
    %473 = vector.broadcast %cst_89 : f32 to vector<2x32xf32>
    %cst_90 = arith.constant 0.000000e+00 : f32
    %474 = vector.broadcast %cst_90 : f32 to vector<2x32xf32>
    %475 = vector.extract_strided_slice %472 {offsets = [0, 0], sizes = [2, 128], strides = [1, 1]} : vector<16x128xf32> to vector<2x128xf32>
    %cst_91 = arith.constant dense<0.000000e+00> : vector<2x128xf32>
    %476 = tpu.matmul %473, %468, %cst_91 {dimension_numbers = #tpu.dot_dimension_numbers<[1], [0], [0], [1], [0, 0, 1, 1], [], []>} : vector<2x32xf32>, vector<32x128xf32>, vector<2x128xf32> -> vector<2x128xf32>
    %477 = arith.addf %475, %476 : vector<2x128xf32>
    %478 = vector.extract_strided_slice %477 {offsets = [0, 0], sizes = [2, 32], strides = [1, 1]} : vector<2x128xf32> to vector<2x32xf32>
    %479 = arith.negf %478 : vector<2x32xf32>
    %480 = math.exp %479 : vector<2x32xf32>
    %cst_92 = arith.constant 1.000000e+00 : f32
    %481 = vector.broadcast %cst_92 : f32 to vector<2x32xf32>
    %482 = arith.addf %481, %480 : vector<2x32xf32>
    %483 = arith.divf %481, %482 : vector<2x32xf32>
    %484 = vector.extract_strided_slice %477 {offsets = [0, 32], sizes = [2, 32], strides = [1, 1]} : vector<2x128xf32> to vector<2x32xf32>
    %485 = arith.negf %484 : vector<2x32xf32>
    %486 = math.exp %485 : vector<2x32xf32>
    %cst_93 = arith.constant 1.000000e+00 : f32
    %487 = vector.broadcast %cst_93 : f32 to vector<2x32xf32>
    %488 = arith.addf %487, %486 : vector<2x32xf32>
    %489 = arith.divf %487, %488 : vector<2x32xf32>
    %490 = vector.extract_strided_slice %477 {offsets = [0, 64], sizes = [2, 32], strides = [1, 1]} : vector<2x128xf32> to vector<2x32xf32>
    %491 = math.tanh %490 : vector<2x32xf32>
    %492 = vector.extract_strided_slice %477 {offsets = [0, 96], sizes = [2, 32], strides = [1, 1]} : vector<2x128xf32> to vector<2x32xf32>
    %493 = arith.negf %492 : vector<2x32xf32>
    %494 = math.exp %493 : vector<2x32xf32>
    %cst_94 = arith.constant 1.000000e+00 : f32
    %495 = vector.broadcast %cst_94 : f32 to vector<2x32xf32>
    %496 = arith.addf %495, %494 : vector<2x32xf32>
    %497 = arith.divf %495, %496 : vector<2x32xf32>
    %498 = arith.mulf %489, %474 : vector<2x32xf32>
    %499 = arith.mulf %483, %491 : vector<2x32xf32>
    %500 = arith.addf %498, %499 : vector<2x32xf32>
    %501 = math.tanh %500 : vector<2x32xf32>
    %502 = arith.mulf %497, %501 : vector<2x32xf32>
    %503 = vector.extract_strided_slice %472 {offsets = [2, 0], sizes = [2, 128], strides = [1, 1]} : vector<16x128xf32> to vector<2x128xf32>
    %cst_95 = arith.constant dense<0.000000e+00> : vector<2x128xf32>
    %504 = tpu.matmul %502, %468, %cst_95 {dimension_numbers = #tpu.dot_dimension_numbers<[1], [0], [0], [1], [0, 0, 1, 1], [], []>} : vector<2x32xf32>, vector<32x128xf32>, vector<2x128xf32> -> vector<2x128xf32>
    %505 = arith.addf %503, %504 : vector<2x128xf32>
    %506 = vector.extract_strided_slice %505 {offsets = [0, 0], sizes = [2, 32], strides = [1, 1]} : vector<2x128xf32> to vector<2x32xf32>
    %507 = arith.negf %506 : vector<2x32xf32>
    %508 = math.exp %507 : vector<2x32xf32>
    %cst_96 = arith.constant 1.000000e+00 : f32
    %509 = vector.broadcast %cst_96 : f32 to vector<2x32xf32>
    %510 = arith.addf %509, %508 : vector<2x32xf32>
    %511 = arith.divf %509, %510 : vector<2x32xf32>
    %512 = vector.extract_strided_slice %505 {offsets = [0, 32], sizes = [2, 32], strides = [1, 1]} : vector<2x128xf32> to vector<2x32xf32>
    %513 = arith.negf %512 : vector<2x32xf32>
    %514 = math.exp %513 : vector<2x32xf32>
    %cst_97 = arith.constant 1.000000e+00 : f32
    %515 = vector.broadcast %cst_97 : f32 to vector<2x32xf32>
    %516 = arith.addf %515, %514 : vector<2x32xf32>
    %517 = arith.divf %515, %516 : vector<2x32xf32>
    %518 = vector.extract_strided_slice %505 {offsets = [0, 64], sizes = [2, 32], strides = [1, 1]} : vector<2x128xf32> to vector<2x32xf32>
    %519 = math.tanh %518 : vector<2x32xf32>
    %520 = vector.extract_strided_slice %505 {offsets = [0, 96], sizes = [2, 32], strides = [1, 1]} : vector<2x128xf32> to vector<2x32xf32>
    %521 = arith.negf %520 : vector<2x32xf32>
    %522 = math.exp %521 : vector<2x32xf32>
    %cst_98 = arith.constant 1.000000e+00 : f32
    %523 = vector.broadcast %cst_98 : f32 to vector<2x32xf32>
    %524 = arith.addf %523, %522 : vector<2x32xf32>
    %525 = arith.divf %523, %524 : vector<2x32xf32>
    %526 = arith.mulf %517, %500 : vector<2x32xf32>
    %527 = arith.mulf %511, %519 : vector<2x32xf32>
    %528 = arith.addf %526, %527 : vector<2x32xf32>
    %529 = math.tanh %528 : vector<2x32xf32>
    %530 = arith.mulf %525, %529 : vector<2x32xf32>
    %531 = vector.extract_strided_slice %472 {offsets = [4, 0], sizes = [2, 128], strides = [1, 1]} : vector<16x128xf32> to vector<2x128xf32>
    %cst_99 = arith.constant dense<0.000000e+00> : vector<2x128xf32>
    %532 = tpu.matmul %530, %468, %cst_99 {dimension_numbers = #tpu.dot_dimension_numbers<[1], [0], [0], [1], [0, 0, 1, 1], [], []>} : vector<2x32xf32>, vector<32x128xf32>, vector<2x128xf32> -> vector<2x128xf32>
    %533 = arith.addf %531, %532 : vector<2x128xf32>
    %534 = vector.extract_strided_slice %533 {offsets = [0, 0], sizes = [2, 32], strides = [1, 1]} : vector<2x128xf32> to vector<2x32xf32>
    %535 = arith.negf %534 : vector<2x32xf32>
    %536 = math.exp %535 : vector<2x32xf32>
    %cst_100 = arith.constant 1.000000e+00 : f32
    %537 = vector.broadcast %cst_100 : f32 to vector<2x32xf32>
    %538 = arith.addf %537, %536 : vector<2x32xf32>
    %539 = arith.divf %537, %538 : vector<2x32xf32>
    %540 = vector.extract_strided_slice %533 {offsets = [0, 32], sizes = [2, 32], strides = [1, 1]} : vector<2x128xf32> to vector<2x32xf32>
    %541 = arith.negf %540 : vector<2x32xf32>
    %542 = math.exp %541 : vector<2x32xf32>
    %cst_101 = arith.constant 1.000000e+00 : f32
    %543 = vector.broadcast %cst_101 : f32 to vector<2x32xf32>
    %544 = arith.addf %543, %542 : vector<2x32xf32>
    %545 = arith.divf %543, %544 : vector<2x32xf32>
    %546 = vector.extract_strided_slice %533 {offsets = [0, 64], sizes = [2, 32], strides = [1, 1]} : vector<2x128xf32> to vector<2x32xf32>
    %547 = math.tanh %546 : vector<2x32xf32>
    %548 = vector.extract_strided_slice %533 {offsets = [0, 96], sizes = [2, 32], strides = [1, 1]} : vector<2x128xf32> to vector<2x32xf32>
    %549 = arith.negf %548 : vector<2x32xf32>
    %550 = math.exp %549 : vector<2x32xf32>
    %cst_102 = arith.constant 1.000000e+00 : f32
    %551 = vector.broadcast %cst_102 : f32 to vector<2x32xf32>
    %552 = arith.addf %551, %550 : vector<2x32xf32>
    %553 = arith.divf %551, %552 : vector<2x32xf32>
    %554 = arith.mulf %545, %528 : vector<2x32xf32>
    %555 = arith.mulf %539, %547 : vector<2x32xf32>
    %556 = arith.addf %554, %555 : vector<2x32xf32>
    %557 = math.tanh %556 : vector<2x32xf32>
    %558 = arith.mulf %553, %557 : vector<2x32xf32>
    %559 = vector.extract_strided_slice %472 {offsets = [6, 0], sizes = [2, 128], strides = [1, 1]} : vector<16x128xf32> to vector<2x128xf32>
    %cst_103 = arith.constant dense<0.000000e+00> : vector<2x128xf32>
    %560 = tpu.matmul %558, %468, %cst_103 {dimension_numbers = #tpu.dot_dimension_numbers<[1], [0], [0], [1], [0, 0, 1, 1], [], []>} : vector<2x32xf32>, vector<32x128xf32>, vector<2x128xf32> -> vector<2x128xf32>
    %561 = arith.addf %559, %560 : vector<2x128xf32>
    %562 = vector.extract_strided_slice %561 {offsets = [0, 0], sizes = [2, 32], strides = [1, 1]} : vector<2x128xf32> to vector<2x32xf32>
    %563 = arith.negf %562 : vector<2x32xf32>
    %564 = math.exp %563 : vector<2x32xf32>
    %cst_104 = arith.constant 1.000000e+00 : f32
    %565 = vector.broadcast %cst_104 : f32 to vector<2x32xf32>
    %566 = arith.addf %565, %564 : vector<2x32xf32>
    %567 = arith.divf %565, %566 : vector<2x32xf32>
    %568 = vector.extract_strided_slice %561 {offsets = [0, 32], sizes = [2, 32], strides = [1, 1]} : vector<2x128xf32> to vector<2x32xf32>
    %569 = arith.negf %568 : vector<2x32xf32>
    %570 = math.exp %569 : vector<2x32xf32>
    %cst_105 = arith.constant 1.000000e+00 : f32
    %571 = vector.broadcast %cst_105 : f32 to vector<2x32xf32>
    %572 = arith.addf %571, %570 : vector<2x32xf32>
    %573 = arith.divf %571, %572 : vector<2x32xf32>
    %574 = vector.extract_strided_slice %561 {offsets = [0, 64], sizes = [2, 32], strides = [1, 1]} : vector<2x128xf32> to vector<2x32xf32>
    %575 = math.tanh %574 : vector<2x32xf32>
    %576 = vector.extract_strided_slice %561 {offsets = [0, 96], sizes = [2, 32], strides = [1, 1]} : vector<2x128xf32> to vector<2x32xf32>
    %577 = arith.negf %576 : vector<2x32xf32>
    %578 = math.exp %577 : vector<2x32xf32>
    %cst_106 = arith.constant 1.000000e+00 : f32
    %579 = vector.broadcast %cst_106 : f32 to vector<2x32xf32>
    %580 = arith.addf %579, %578 : vector<2x32xf32>
    %581 = arith.divf %579, %580 : vector<2x32xf32>
    %582 = arith.mulf %573, %556 : vector<2x32xf32>
    %583 = arith.mulf %567, %575 : vector<2x32xf32>
    %584 = arith.addf %582, %583 : vector<2x32xf32>
    %585 = math.tanh %584 : vector<2x32xf32>
    %586 = arith.mulf %581, %585 : vector<2x32xf32>
    %587 = vector.extract_strided_slice %472 {offsets = [8, 0], sizes = [2, 128], strides = [1, 1]} : vector<16x128xf32> to vector<2x128xf32>
    %cst_107 = arith.constant dense<0.000000e+00> : vector<2x128xf32>
    %588 = tpu.matmul %586, %468, %cst_107 {dimension_numbers = #tpu.dot_dimension_numbers<[1], [0], [0], [1], [0, 0, 1, 1], [], []>} : vector<2x32xf32>, vector<32x128xf32>, vector<2x128xf32> -> vector<2x128xf32>
    %589 = arith.addf %587, %588 : vector<2x128xf32>
    %590 = vector.extract_strided_slice %589 {offsets = [0, 0], sizes = [2, 32], strides = [1, 1]} : vector<2x128xf32> to vector<2x32xf32>
    %591 = arith.negf %590 : vector<2x32xf32>
    %592 = math.exp %591 : vector<2x32xf32>
    %cst_108 = arith.constant 1.000000e+00 : f32
    %593 = vector.broadcast %cst_108 : f32 to vector<2x32xf32>
    %594 = arith.addf %593, %592 : vector<2x32xf32>
    %595 = arith.divf %593, %594 : vector<2x32xf32>
    %596 = vector.extract_strided_slice %589 {offsets = [0, 32], sizes = [2, 32], strides = [1, 1]} : vector<2x128xf32> to vector<2x32xf32>
    %597 = arith.negf %596 : vector<2x32xf32>
    %598 = math.exp %597 : vector<2x32xf32>
    %cst_109 = arith.constant 1.000000e+00 : f32
    %599 = vector.broadcast %cst_109 : f32 to vector<2x32xf32>
    %600 = arith.addf %599, %598 : vector<2x32xf32>
    %601 = arith.divf %599, %600 : vector<2x32xf32>
    %602 = vector.extract_strided_slice %589 {offsets = [0, 64], sizes = [2, 32], strides = [1, 1]} : vector<2x128xf32> to vector<2x32xf32>
    %603 = math.tanh %602 : vector<2x32xf32>
    %604 = vector.extract_strided_slice %589 {offsets = [0, 96], sizes = [2, 32], strides = [1, 1]} : vector<2x128xf32> to vector<2x32xf32>
    %605 = arith.negf %604 : vector<2x32xf32>
    %606 = math.exp %605 : vector<2x32xf32>
    %cst_110 = arith.constant 1.000000e+00 : f32
    %607 = vector.broadcast %cst_110 : f32 to vector<2x32xf32>
    %608 = arith.addf %607, %606 : vector<2x32xf32>
    %609 = arith.divf %607, %608 : vector<2x32xf32>
    %610 = arith.mulf %601, %584 : vector<2x32xf32>
    %611 = arith.mulf %595, %603 : vector<2x32xf32>
    %612 = arith.addf %610, %611 : vector<2x32xf32>
    %613 = math.tanh %612 : vector<2x32xf32>
    %614 = arith.mulf %609, %613 : vector<2x32xf32>
    %615 = vector.extract_strided_slice %472 {offsets = [10, 0], sizes = [2, 128], strides = [1, 1]} : vector<16x128xf32> to vector<2x128xf32>
    %cst_111 = arith.constant dense<0.000000e+00> : vector<2x128xf32>
    %616 = tpu.matmul %614, %468, %cst_111 {dimension_numbers = #tpu.dot_dimension_numbers<[1], [0], [0], [1], [0, 0, 1, 1], [], []>} : vector<2x32xf32>, vector<32x128xf32>, vector<2x128xf32> -> vector<2x128xf32>
    %617 = arith.addf %615, %616 : vector<2x128xf32>
    %618 = vector.extract_strided_slice %617 {offsets = [0, 0], sizes = [2, 32], strides = [1, 1]} : vector<2x128xf32> to vector<2x32xf32>
    %619 = arith.negf %618 : vector<2x32xf32>
    %620 = math.exp %619 : vector<2x32xf32>
    %cst_112 = arith.constant 1.000000e+00 : f32
    %621 = vector.broadcast %cst_112 : f32 to vector<2x32xf32>
    %622 = arith.addf %621, %620 : vector<2x32xf32>
    %623 = arith.divf %621, %622 : vector<2x32xf32>
    %624 = vector.extract_strided_slice %617 {offsets = [0, 32], sizes = [2, 32], strides = [1, 1]} : vector<2x128xf32> to vector<2x32xf32>
    %625 = arith.negf %624 : vector<2x32xf32>
    %626 = math.exp %625 : vector<2x32xf32>
    %cst_113 = arith.constant 1.000000e+00 : f32
    %627 = vector.broadcast %cst_113 : f32 to vector<2x32xf32>
    %628 = arith.addf %627, %626 : vector<2x32xf32>
    %629 = arith.divf %627, %628 : vector<2x32xf32>
    %630 = vector.extract_strided_slice %617 {offsets = [0, 64], sizes = [2, 32], strides = [1, 1]} : vector<2x128xf32> to vector<2x32xf32>
    %631 = math.tanh %630 : vector<2x32xf32>
    %632 = vector.extract_strided_slice %617 {offsets = [0, 96], sizes = [2, 32], strides = [1, 1]} : vector<2x128xf32> to vector<2x32xf32>
    %633 = arith.negf %632 : vector<2x32xf32>
    %634 = math.exp %633 : vector<2x32xf32>
    %cst_114 = arith.constant 1.000000e+00 : f32
    %635 = vector.broadcast %cst_114 : f32 to vector<2x32xf32>
    %636 = arith.addf %635, %634 : vector<2x32xf32>
    %637 = arith.divf %635, %636 : vector<2x32xf32>
    %638 = arith.mulf %629, %612 : vector<2x32xf32>
    %639 = arith.mulf %623, %631 : vector<2x32xf32>
    %640 = arith.addf %638, %639 : vector<2x32xf32>
    %641 = math.tanh %640 : vector<2x32xf32>
    %642 = arith.mulf %637, %641 : vector<2x32xf32>
    %643 = vector.extract_strided_slice %472 {offsets = [12, 0], sizes = [2, 128], strides = [1, 1]} : vector<16x128xf32> to vector<2x128xf32>
    %cst_115 = arith.constant dense<0.000000e+00> : vector<2x128xf32>
    %644 = tpu.matmul %642, %468, %cst_115 {dimension_numbers = #tpu.dot_dimension_numbers<[1], [0], [0], [1], [0, 0, 1, 1], [], []>} : vector<2x32xf32>, vector<32x128xf32>, vector<2x128xf32> -> vector<2x128xf32>
    %645 = arith.addf %643, %644 : vector<2x128xf32>
    %646 = vector.extract_strided_slice %645 {offsets = [0, 0], sizes = [2, 32], strides = [1, 1]} : vector<2x128xf32> to vector<2x32xf32>
    %647 = arith.negf %646 : vector<2x32xf32>
    %648 = math.exp %647 : vector<2x32xf32>
    %cst_116 = arith.constant 1.000000e+00 : f32
    %649 = vector.broadcast %cst_116 : f32 to vector<2x32xf32>
    %650 = arith.addf %649, %648 : vector<2x32xf32>
    %651 = arith.divf %649, %650 : vector<2x32xf32>
    %652 = vector.extract_strided_slice %645 {offsets = [0, 32], sizes = [2, 32], strides = [1, 1]} : vector<2x128xf32> to vector<2x32xf32>
    %653 = arith.negf %652 : vector<2x32xf32>
    %654 = math.exp %653 : vector<2x32xf32>
    %cst_117 = arith.constant 1.000000e+00 : f32
    %655 = vector.broadcast %cst_117 : f32 to vector<2x32xf32>
    %656 = arith.addf %655, %654 : vector<2x32xf32>
    %657 = arith.divf %655, %656 : vector<2x32xf32>
    %658 = vector.extract_strided_slice %645 {offsets = [0, 64], sizes = [2, 32], strides = [1, 1]} : vector<2x128xf32> to vector<2x32xf32>
    %659 = math.tanh %658 : vector<2x32xf32>
    %660 = vector.extract_strided_slice %645 {offsets = [0, 96], sizes = [2, 32], strides = [1, 1]} : vector<2x128xf32> to vector<2x32xf32>
    %661 = arith.negf %660 : vector<2x32xf32>
    %662 = math.exp %661 : vector<2x32xf32>
    %cst_118 = arith.constant 1.000000e+00 : f32
    %663 = vector.broadcast %cst_118 : f32 to vector<2x32xf32>
    %664 = arith.addf %663, %662 : vector<2x32xf32>
    %665 = arith.divf %663, %664 : vector<2x32xf32>
    %666 = arith.mulf %657, %640 : vector<2x32xf32>
    %667 = arith.mulf %651, %659 : vector<2x32xf32>
    %668 = arith.addf %666, %667 : vector<2x32xf32>
    %669 = math.tanh %668 : vector<2x32xf32>
    %670 = arith.mulf %665, %669 : vector<2x32xf32>
    %671 = vector.extract_strided_slice %472 {offsets = [14, 0], sizes = [2, 128], strides = [1, 1]} : vector<16x128xf32> to vector<2x128xf32>
    %cst_119 = arith.constant dense<0.000000e+00> : vector<2x128xf32>
    %672 = tpu.matmul %670, %468, %cst_119 {dimension_numbers = #tpu.dot_dimension_numbers<[1], [0], [0], [1], [0, 0, 1, 1], [], []>} : vector<2x32xf32>, vector<32x128xf32>, vector<2x128xf32> -> vector<2x128xf32>
    %673 = arith.addf %671, %672 : vector<2x128xf32>
    %674 = vector.extract_strided_slice %673 {offsets = [0, 0], sizes = [2, 32], strides = [1, 1]} : vector<2x128xf32> to vector<2x32xf32>
    %675 = arith.negf %674 : vector<2x32xf32>
    %676 = math.exp %675 : vector<2x32xf32>
    %cst_120 = arith.constant 1.000000e+00 : f32
    %677 = vector.broadcast %cst_120 : f32 to vector<2x32xf32>
    %678 = arith.addf %677, %676 : vector<2x32xf32>
    %679 = arith.divf %677, %678 : vector<2x32xf32>
    %680 = vector.extract_strided_slice %673 {offsets = [0, 32], sizes = [2, 32], strides = [1, 1]} : vector<2x128xf32> to vector<2x32xf32>
    %681 = arith.negf %680 : vector<2x32xf32>
    %682 = math.exp %681 : vector<2x32xf32>
    %cst_121 = arith.constant 1.000000e+00 : f32
    %683 = vector.broadcast %cst_121 : f32 to vector<2x32xf32>
    %684 = arith.addf %683, %682 : vector<2x32xf32>
    %685 = arith.divf %683, %684 : vector<2x32xf32>
    %686 = vector.extract_strided_slice %673 {offsets = [0, 64], sizes = [2, 32], strides = [1, 1]} : vector<2x128xf32> to vector<2x32xf32>
    %687 = math.tanh %686 : vector<2x32xf32>
    %688 = vector.extract_strided_slice %673 {offsets = [0, 96], sizes = [2, 32], strides = [1, 1]} : vector<2x128xf32> to vector<2x32xf32>
    %689 = arith.negf %688 : vector<2x32xf32>
    %690 = math.exp %689 : vector<2x32xf32>
    %cst_122 = arith.constant 1.000000e+00 : f32
    %691 = vector.broadcast %cst_122 : f32 to vector<2x32xf32>
    %692 = arith.addf %691, %690 : vector<2x32xf32>
    %693 = arith.divf %691, %692 : vector<2x32xf32>
    %694 = arith.mulf %685, %668 : vector<2x32xf32>
    %695 = arith.mulf %679, %687 : vector<2x32xf32>
    %696 = arith.addf %694, %695 : vector<2x32xf32>
    %697 = math.tanh %696 : vector<2x32xf32>
    %698 = arith.mulf %693, %697 : vector<2x32xf32>
    %c0_123 = arith.constant 0 : index
    %c0_124 = arith.constant 0 : index
    %699 = vector.load %arg10[%c0_123, %c0_124] : memref<32x32xf32, #tpu.memory_space<vmem>>, vector<32x32xf32>
    %cst_125 = arith.constant dense<0.000000e+00> : vector<2x32xf32>
    %700 = tpu.matmul %698, %699, %cst_125 {dimension_numbers = #tpu.dot_dimension_numbers<[1], [0], [0], [1], [0, 0, 1, 1], [], []>} : vector<2x32xf32>, vector<32x32xf32>, vector<2x32xf32> -> vector<2x32xf32>
    %c0_126 = arith.constant 0 : index
    %c0_127 = arith.constant 0 : index
    %701 = vector.load %arg11[%c0_126, %c0_127] : memref<1x32xf32, #tpu.memory_space<vmem>>, vector<1x32xf32>
    %702 = vector.broadcast %701 : vector<1x32xf32> to vector<2x32xf32>
    %703 = arith.addf %700, %702 : vector<2x32xf32>
    %cst_128 = arith.constant 0.000000e+00 : f32
    %704 = vector.broadcast %cst_128 : f32 to vector<2x32xf32>
    %705 = arith.maximumf %703, %704 : vector<2x32xf32>
    %706 = arith.mulf %705, %705 : vector<2x32xf32>
    %cst_129 = arith.constant dense<0.000000e+00> : vector<2xf32>
    %707 = vector.multi_reduction <add>, %706, %cst_129 [1] : vector<2x32xf32> to vector<2xf32>
    %708 = vector.shape_cast %707 : vector<2xf32> to vector<2x1xf32>
    %709 = math.rsqrt %708 : vector<2x1xf32>
    %710 = vector.broadcast %709 : vector<2x1xf32> to vector<2x32xf32>
    %711 = arith.mulf %705, %710 : vector<2x32xf32>
    %c0_130 = arith.constant 0 : index
    %c0_131 = arith.constant 0 : index
    %712 = vector.load %arg12[%c0_130, %c0_131] : memref<2x32xf32, #tpu.memory_space<vmem>>, vector<2x32xf32>
    tpu.vector_store %arg12[%c0_130, %c0_131], %711 {strides = array<i32>} : memref<2x32xf32, #tpu.memory_space<vmem>>, vector<2x32xf32>,
    return
  }
}

</mosaic_0001>

<bundles_post_ra>
// kernel: speaker_encoder_forward.1
= control target key start
LH: loop header
LB: loop body
LE: loop exit
PB: predicated region body
PF: predicated region fallthrough
CT: control target
= control target key end

     0   :  { %17 = vsyncpa [#allocation3], 0  ;;  %s4654_s0 = inlined_call_operand.vmem [shape: f32[16,16], index: 0, kind: input, shape index: {}]   ;;  %s4655_s1 = inlined_call_operand.hbm [shape: f32[16,128], index: 1, kind: input, shape index: {}]   ;;  %s4656_s2 = inlined_call_operand.vmem [shape: f32[32,128], index: 2, kind: input, shape index: {}]   ;;  %s4657_s3 = inlined_call_operand.vmem [shape: f32[1,128], index: 3, kind: input, shape index: {}]   ;;  %s4658_s4 = inlined_call_operand.hbm [shape: f32[32,128], index: 4, kind: input, shape index: {}]   ;;  %s4659_s5 = inlined_call_operand.hbm [shape: f32[32,128], index: 5, kind: input, shape index: {}]   ;;  %s4660_s6 = inlined_call_operand.vmem [shape: f32[1,128], index: 6, kind: input, shape index: {}]   ;;  %s4661_s7 = inlined_call_operand.vmem [shape: f32[32,128], index: 7, kind: input, shape index: {}]   ;;  %s4662_s8 = inlined_call_operand.hbm [shape: f32[32,128], index: 8, kind: input, shape index: {}]   ;;  %s4663_s9 = inlined_call_operand.vmem [shape: f32[1,128], index: 9, kind: input, shape index: {}]   ;;  %s4664_s10 = inlined_call_operand.hbm [shape: f32[32,32], index: 10, kind: input, shape index: {}]   ;;  %s4665_s11 = inlined_call_operand.vmem [shape: f32[1,32], index: 11, kind: input, shape index: {}]   ;;  %s4666_s12 = inlined_call_operand.hbm [shape: f32[2,32], index: 12, kind: output, shape index: {}]  }
   0x1   :  { %18 = vsyncpa [#allocation6], 0 }
   0x2   :  { %19 = vsyncpa [#allocation9], 0 }
   0x3   :  { %20 = vsyncpa [#allocation4], 0  ;;  %s4074_s21 = smov [#allocation5]   ;;  %s4075_s23 = smov [#allocation8]  }
   0x4   :  { %s44_s22 = sshll.u32 %s4074_s21, 4  ;;  %s72_s24 = sshll.u32 %s4075_s23, 4  ;;  %s45_s22 = int_to_ptr.vmem [resolvable:$true] %s44_s22  ;;  %s4152_s24 = int_to_ptr.vmem [resolvable:$true] %s72_s24 }
   0x5   :  { %s3934_s27 = scalar_lea.hbm %s4658_s4, 512 }
   0x6   :  { %p3935_p0 = scmp.ne.s32.totalorder %s4658_s4, %s3934_s27  ;;  %p3938_p1 = scmp.lt.u32.totalorder %s3934_s27, %s4658_s4 }
   0x8   :  { %p3940_p2 = pnand %p3938_p1, %p3935_p0 }
   0xa   :  { %3943 = shalt.err (!%p3940_p2)
}
   0xb   :  { %s3944_s14 = scalar_lea.vmem %s45_s22, 512  ;;  %p3949_p4 = scmp.lt.s32.totalorder %s45_s22, %s45_s22 }
   0xc   :  { %p3945_p3 = scmp.ne.s32.totalorder %s45_s22, %s3944_s14  ;;  %p3950_p5 = scmp.lt.s32.totalorder %s3944_s14, %s3944_s14 }
   0xe   :  { %p3951_p6 = por %p3950_p5, %p3949_p4 }
  0x10   :  { %p3952_p7 = pnand %p3951_p6, %p3945_p3 }
  0x12   :  { %3955 = shalt.err (!%p3952_p7)
}
  0x13   :  { %s4076_s15 = smov 128   ;;  %s4077_s16 = smov 8  }
  0x14   :  { %50 = dma.hbm_to_vmem [thread:$0]  %s4658_s4, 512, %s45_s22, [#allocation6], %s4076_s15, %s4076_s15, %s4077_s16  }
  0x15   :  { %s3956_s21 = scalar_lea.hbm %s4662_s8, 512 }
  0x16   :  { %p3957_p8 = scmp.ne.s32.totalorder %s4662_s8, %s3956_s21  ;;  %p3960_p9 = scmp.lt.u32.totalorder %s3956_s21, %s4662_s8 }
  0x18   :  { %p3962_p10 = pnand %p3960_p9, %p3957_p8 }
  0x1a   :  { %3965 = shalt.err (!%p3962_p10)
}
  0x1b   :  { %s3966_s28 = scalar_lea.vmem %s4152_s24, 512  ;;  %p3971_p12 = scmp.lt.s32.totalorder %s4152_s24, %s4152_s24 }
  0x1c   :  { %p3967_p11 = scmp.ne.s32.totalorder %s4152_s24, %s3966_s28  ;;  %p3972_p13 = scmp.lt.s32.totalorder %s3966_s28, %s3966_s28 }
  0x1e   :  { %p3973_p0 = por %p3972_p13, %p3971_p12 }
  0x20   :  { %p3974_p1 = pnand %p3973_p0, %p3967_p11 }
  0x22   :  { %3977 = shalt.err (!%p3974_p1)
}
  0x23   :  { %78 = dma.hbm_to_vmem [thread:$0]  %s4662_s8, 512, %s4152_s24, [#allocation9], %s4076_s15, %s4076_s15, %s4077_s16  }
  0x24   :  { %s4078_s29 = smov [#allocation2]   ;;  %s4079_s13 = smov [#allocation7]  }
  0x25   :  { %s28_s30 = sshll.u32 %s4078_s29, 4  ;;  %s56_s14 = sshll.u32 %s4079_s13, 4  ;;  %s29_s30 = int_to_ptr.vmem [resolvable:$true] %s28_s30  ;;  %s4189_s14 = int_to_ptr.vmem [resolvable:$true] %s56_s14 }
  0x26   :  { %s3978_s19 = scalar_lea.hbm %s4655_s1, 256 }
  0x27   :  { %p3979_p2 = scmp.ne.s32.totalorder %s4655_s1, %s3978_s19  ;;  %p3982_p3 = scmp.lt.u32.totalorder %s3978_s19, %s4655_s1 }
  0x29   :  { %p3984_p4 = pnand %p3982_p3, %p3979_p2 }
  0x2b   :  { %3987 = shalt.err (!%p3984_p4)
}
  0x2c   :  { %s3988_s8 = scalar_lea.vmem %s29_s30, 256  ;;  %p3993_p6 = scmp.lt.s32.totalorder %s29_s30, %s29_s30 }
  0x2d   :  { %p3989_p5 = scmp.ne.s32.totalorder %s29_s30, %s3988_s8  ;;  %p3994_p7 = scmp.lt.s32.totalorder %s3988_s8, %s3988_s8 }
  0x2f   :  { %p3995_p8 = por %p3994_p7, %p3993_p6 }
  0x31   :  { %p3996_p9 = pnand %p3995_p8, %p3989_p5 }
  0x33   :  { %3999 = shalt.err (!%p3996_p9)
}
  0x34   :  { %34 = dma.hbm_to_vmem [thread:$0]  %s4655_s1, 256, %s29_s30, [#allocation3], %s4076_s15, %s4076_s15, %s4077_s16  }
  0x35   :  { %s4000_s4 = scalar_lea.hbm %s4659_s5, 512 }
  0x36   :  { %p4001_p10 = scmp.ne.s32.totalorder %s4659_s5, %s4000_s4  ;;  %p4004_p11 = scmp.lt.u32.totalorder %s4000_s4, %s4659_s5 }
  0x38   :  { %p4006_p12 = pnand %p4004_p11, %p4001_p10 }
  0x3a   :  { %4009 = shalt.err (!%p4006_p12)
}
  0x3b   :  { %s4010_s18 = scalar_lea.vmem %s4189_s14, 512  ;;  %p4015_p0 = scmp.lt.s32.totalorder %s4189_s14, %s4189_s14 }
  0x3c   :  { %p4011_p13 = scmp.ne.s32.totalorder %s4189_s14, %s4010_s18  ;;  %p4016_p1 = scmp.lt.s32.totalorder %s4010_s18, %s4010_s18 }
  0x3e   :  { %p4017_p2 = por %p4016_p1, %p4015_p0 }
  0x40   :  { %p4018_p3 = pnand %p4017_p2, %p4011_p13 }
  0x42   :  { %4021 = shalt.err (!%p4018_p3)
}
  0x43   :  { %62 = dma.hbm_to_vmem [thread:$0]  %s4659_s5, 512, %s4189_s14, [#allocation6], %s4076_s15, %s4076_s15, %s4077_s16  }
  0x44   :  { %s4080_s19 = smov [#allocation10]   ;;  %s4022_s25 = scalar_lea.hbm %s4664_s10, 512 }
  0x45   :  { %s86_s20 = sshll.u32 %s4080_s19, 4  ;;  %p4023_p4 = scmp.ne.s32.totalorder %s4664_s10, %s4022_s25  ;;  %s87_s20 = int_to_ptr.vmem [resolvable:$true] %s86_s20 }
  0x46   :  { %p4026_p5 = scmp.lt.u32.totalorder %s4022_s25, %s4664_s10 }
  0x48   :  { %p4028_p6 = pnand %p4026_p5, %p4023_p4 }
  0x4a   :  { %4031 = shalt.err (!%p4028_p6)
}
  0x4b   :  { %s4032_s28 = scalar_lea.vmem %s87_s20, 512  ;;  %p4037_p8 = scmp.lt.s32.totalorder %s87_s20, %s87_s20 }
  0x4c   :  { %p4033_p7 = scmp.ne.s32.totalorder %s87_s20, %s4032_s28  ;;  %p4038_p9 = scmp.lt.s32.totalorder %s4032_s28, %s4032_s28 }
  0x4e   :  { %p4039_p10 = por %p4038_p9, %p4037_p8 }
  0x50   :  { %p4040_p11 = pnand %p4039_p10, %p4033_p7 }
  0x52   :  { %4043 = shalt.err (!%p4040_p11)
}
  0x53   :  { %92 = dma.hbm_to_vmem [thread:$0]  %s4664_s10, 512, %s87_s20, [#allocation9], %s4076_s15, %s4076_s15, %s4077_s16  }
  0x54   :  { %4066 = dma.done.wait [#allocation3], 256  }
  0x55   :  { %4067 = vsyncadd [#allocation3], 4294967040 }
  0x56   :  { %4068 = dma.done.wait [#allocation6], 1024  }
  0x57   :  { %4069 = vsyncadd [#allocation6], 4294966272 }
  0x58   :  { %4070 = dma.done.wait [#allocation9], 1024  }
  0x59   :  { %4071 = vsyncadd [#allocation9], 4294966272  ;;  %v4081_v0 = vmov 0.0|0.0   ;;  %vm4082_vm0 = vmmov 0   ;;  %v4083_v1 = vmov 0.0   ;;  %vm125_vm1 = vcmask 130048  }
  0x5a   :  { %3561 = vmatprep.subr.bf16.mxu1 %v4081_v0  ;;  %3268 = vmatprep.mubr.msk.f32.mxu1 %vm4082_vm0, %v4083_v1  ;;  %v112_v2 = vld [vmem:[#allocation2] sm:$0xff]  ;;  %v113_v3 = vld [vmem:[#allocation2 + $0x8] sm:$0xff]  ;;  %v116_v9 = vld [vmem:[%s4656_s2 + $0x10] sm:$0xff]  ;;  %s4084_s20 = smov 64   ;;  %vm207_vm2 = vcmask 261120   ;;  %vm1050_vm3 = vcmask 1041408  }
  0x5b   :  { %v114_v4 = vld [vmem:[%s4656_s2] sm:$0xff]  ;;  %v3557_v5 = vpack.c.bf16 %v113_v3, %v112_v2  ;;  %v115_v6 = vld [vmem:[%s4656_s2 + $0x8] sm:$0xff]  ;;  %v117_v10 = vld [vmem:[%s4656_s2 + $0x18] sm:$0xff]  ;;  %vm1052_vm4 = vcmask 1043456   ;;  %vm1054_vm5 = vcmask 1045504   ;;  %vm3032_vm6 = vcmask 254976  }
  0x5c   :  { %v110_v7 = vld [vmem:[%s4654_s0] sm:$0xff]  ;;  %v4253_v8 = vpack.c.bf16 %v115_v6, %v114_v4  ;;  %v111_v11 = vld [vmem:[%s4654_s0 + $0x8] sm:$0xff]  ;;  %v4266_v12 = vpack.c.bf16 %v117_v10, %v116_v9  ;;  %s4086_s22 = smov [#allocation11]  }
  0x5d   :  { %3257 = vmatprep.mubr.msk.f32.mxu0 %vm125_vm1, %v110_v7  ;;  %3558 = vmatprep.subr.bf16.mxu0 %v3557_v5  ;;  %v3056_v13 = vld [vmem:[%s4657_s3] ss:$0 sm:$0xff]  ;;  %s4085_s3 = smov 32   ;;  %s3045_s10 = sshll.u32 %s4086_s22, 4  ;;  %s3046_s10 = int_to_ptr.vmem [resolvable:$true] %s3045_s10 }
  0x5e   :  { %3563 = vmatpush3.bf16.msra.mxu1 %v4253_v8  ;;  %3560 = vmatpush3.bf16.msra.mxu0 %v3557_v5  ;;  %s4044_s15 = scalar_lea.vmem %s3046_s10, 32  ;;  %p4049_p13 = scmp.lt.s32.totalorder %s3046_s10, %s3046_s10 }
  0x5f   :  { %3564 = vmatprep.subr.bf16.mxu1 %v4081_v0  ;;  %3567 = vmatprep.subr.bf16.mxu0 %v4081_v0  ;;  %p4045_p12 = scmp.ne.s32.totalorder %s3046_s10, %s4044_s15  ;;  %p4050_p0 = scmp.lt.s32.totalorder %s4044_s15, %s4044_s15 }
  0x61   :  { %3258 = vmatmul.mubr.msk.f32.vlgmr.msra.gmra.mrb[0].mxu0 %vm125_vm1, %v111_v11  ;;  %p4051_p1 = por %p4050_p0, %p4049_p13 }
  0x62   :  { %3566 = vmatpush3.bf16.msra.mxu1 %v4266_v12  ;;  %3569 = vmatpush3.bf16.msra.mxu0 %v4253_v8 }
  0x63   :  { %3570 = vmatprep.subr.bf16.mxu0 %v4081_v0  ;;  %3279 = vmatprep.mubr.msk.f32.mxu0 %vm4082_vm0, %v4083_v1  ;;  %p4052_p2 = pnand %p4051_p1, %p4045_p12 }
  0x64   :  { %3573 = vmatprep.subr.bf16.mxu1 %v4081_v0 }
  0x65   :  { %3269 = vmatmul.mubr.f32.vlgmr.msra.gmra.mrb[0].mxu1 %v4083_v1 }
  0x66   :  { %3572 = vmatpush3.bf16.msra.mxu0 %v4266_v12  ;;  %3575 = vmatpush3.bf16.msra.mxu1 %v4253_v8 }
  0x67   :  { %3576 = vmatprep.subr.bf16.mxu1 %v4081_v0  ;;  %3290 = vmatprep.mubr.msk.f32.mxu1 %vm4082_vm0, %v4083_v1 }
  0x68   :  { %3579 = vmatprep.subr.bf16.mxu0 %v4081_v0 }
  0x6a   :  { %3578 = vmatpush3.bf16.msra.mxu1 %v4266_v12 }
  0x6b   :  { %3585 = vmatprep.subr.bf16.mxu1 %v4081_v0 }
 0x134   :  { %v3259_v14 = vpop.f32.mrb[0].mxu0 }
 0x135   :  { %v4289_v15 = vadd.f32 %v3259_v14, %v3056_v13  ;;  %v198_v16 = vpop.f32.mrb[1].mxu0 }
 0x136   :  { %v4291_v17 = vadd.f32 %v3056_v13, %v198_v16 }
 0x138   :  { %v277_v18 = vpop.f32.mrb[0].mxu1 }
 0x139   :  { %v281_v19 = vadd.f32 %v277_v18, %v4291_v17  ;;  %v3270_v20 = vpop.f32.mrb[1].mxu1 }
 0x13b   :  { %3740 = vtanh.f32 %v281_v19  ;;  %v3059_v22 = vmul.f32 -1.442695, %v281_v19 }
 0x13d   :  { %3742 = vpow2.f32 %v3059_v22 }
 0x145   :  { %v3741_v21 = vpop.eup %3740 }
 0x146   :  { %291 = vrot.lane.b32.xlu0 %v3741_v21, %s4084_s20 }
 0x147   :  { %v3743_v23 = vpop.eup %3742 }
 0x148   :  { %v285_v24 = vadd.f32 1.0, %v3743_v23 }
 0x14a   :  { %3744 = vrcp.f32 %v285_v24 }
 0x154   :  { %v3745_v25 = vpop.eup %3744 }
 0x155   :  { %v289_v28 = vmul.f32 0.0, %v3745_v25 }
 0x1b8   :  { %v292_v26 = vpop.permute.xlu0 %291 }
 0x1b9   :  { %v294_v27 = vmul.f32 %v3745_v25, %v292_v26 }
 0x1bb   :  { %296 = vrot.lane.b32.xlu0 %v294_v27, %s4085_s3 }
 0x22d   :  { %v297_v29 = vpop.permute.xlu0 %296 }
 0x22e   :  { %v299_v30 = vadd.f32 %v297_v29, %v289_v28 }
 0x230   :  { %3746 = vtanh.f32 %v299_v30  ;;  %v393_v46 = vrot.slane %v299_v30, 6 }
 0x23a   :  { %v3747_v31 = vpop.eup %3746 }
 0x23b   :  { %302 = vrot.lane.b32.xlu1 %v3747_v31, %s4084_s20 }
 0x2ad   :  { %v303_v32 = vpop.permute.xlu1 %302 }
 0x2ae   :  { %v4297_v33 = vmul.f32 %v3745_v25, %v303_v32 }
 0x2b0   :  { %307 = vrot.lane.b32.xlu1 %v4297_v33, %s4085_s3 }
 0x322   :  { %v308_v34 = vpop.permute.xlu1 %307 }
 0x323   :  { %3280 = vmatmul.mubr.msk.f32.vlgmr.msra.gmra.mrb[2].mxu0 %vm207_vm2, %v308_v34 }
 0x324   :  { %3581 = vmatpush3.bf16.msra.mxu0 %v4253_v8  ;;  %3301 = vmatprep.mubr.msk.f32.mxu0 %vm4082_vm0, %v4083_v1 }
 0x325   :  { %3582 = vmatprep.subr.bf16.mxu0 %v4081_v0 }
 0x328   :  { %3584 = vmatpush3.bf16.msra.mxu0 %v4266_v12 }
 0x329   :  { %3591 = vmatprep.subr.bf16.mxu0 %v4081_v0 }
 0x3f6   :  { %v377_v35 = vpop.f32.mrb[2].mxu0 }
 0x3f7   :  { %v382_v36 = vrot.slane %v377_v35, 6  ;;  %v3281_v37 = vpop.f32.mrb[3].mxu0 }
 0x3f9   :  { %v384_v38 = vadd.f32 %v382_v36, %v4291_v17 }
 0x3fb   :  { %3748 = vtanh.f32 %v384_v38  ;;  %v3061_v40 = vmul.f32 -1.442695, %v384_v38 }
 0x3fd   :  { %3750 = vpow2.f32 %v3061_v40 }
 0x405   :  { %v3749_v39 = vpop.eup %3748 }
 0x406   :  { %397 = vrot.lane.b32.xlu0 %v3749_v39, %s4084_s20 }
 0x407   :  { %v3751_v41 = vpop.eup %3750 }
 0x408   :  { %v388_v42 = vadd.f32 1.0, %v3751_v41 }
 0x40a   :  { %3752 = vrcp.f32 %v388_v42 }
 0x414   :  { %v3753_v43 = vpop.eup %3752 }
 0x415   :  { %v395_v47 = vmul.f32 %v3753_v43, %v393_v46 }
 0x478   :  { %v398_v44 = vpop.permute.xlu0 %397 }
 0x479   :  { %v400_v45 = vmul.f32 %v3753_v43, %v398_v44 }
 0x47b   :  { %402 = vrot.lane.b32.xlu1 %v400_v45, %s4085_s3 }
 0x4ed   :  { %v403_v48 = vpop.permute.xlu1 %402 }
 0x4ee   :  { %v405_v49 = vadd.f32 %v403_v48, %v395_v47 }
 0x4f0   :  { %3754 = vtanh.f32 %v405_v49  ;;  %v500_v4 = vrot.slane %v405_v49, 6 }
 0x4fa   :  { %v3755_v50 = vpop.eup %3754 }
 0x4fb   :  { %408 = vrot.lane.b32.xlu0 %v3755_v50, %s4084_s20 }
 0x56d   :  { %v409_v51 = vpop.permute.xlu0 %408 }
 0x56e   :  { %v411_v52 = vmul.f32 %v3753_v43, %v409_v51 }
 0x570   :  { %v413_v53 = vrot.slane %v411_v52, 2  ;;  %v1051_v13 = vsel %vm1050_vm3, %v4297_v33, %v411_v52 }
 0x572   :  { %414 = vrot.lane.b32.xlu1 %v413_v53, %s4085_s3 }
 0x5e4   :  { %v415_v54 = vpop.permute.xlu1 %414 }
 0x5e5   :  { %3291 = vmatmul.mubr.msk.f32.vlgmr.msra.gmra.mrb[2].mxu1 %vm207_vm2, %v415_v54 }
 0x5e6   :  { %3587 = vmatpush3.bf16.msra.mxu1 %v4253_v8  ;;  %3312 = vmatprep.mubr.msk.f32.mxu1 %vm4082_vm0, %v4083_v1 }
 0x5e7   :  { %3588 = vmatprep.subr.bf16.mxu1 %v4081_v0 }
 0x5ea   :  { %3590 = vmatpush3.bf16.msra.mxu1 %v4266_v12 }
 0x5eb   :  { %3597 = vmatprep.subr.bf16.mxu1 %v4081_v0 }
 0x6b8   :  { %v484_v55 = vpop.f32.mrb[2].mxu1 }
 0x6b9   :  { %v489_v56 = vrot.slane %v484_v55, 4  ;;  %v3292_v57 = vpop.f32.mrb[3].mxu1 }
 0x6bb   :  { %v491_v58 = vadd.f32 %v489_v56, %v4291_v17 }
 0x6bd   :  { %3756 = vtanh.f32 %v491_v58  ;;  %v3063_v60 = vmul.f32 -1.442695, %v491_v58 }
 0x6bf   :  { %3758 = vpow2.f32 %v3063_v60 }
 0x6c7   :  { %v3757_v59 = vpop.eup %3756 }
 0x6c8   :  { %504 = vrot.lane.b32.xlu0 %v3757_v59, %s4084_s20 }
 0x6c9   :  { %v3759_v61 = vpop.eup %3758 }
 0x6ca   :  { %v495_v62 = vadd.f32 1.0, %v3759_v61 }
 0x6cc   :  { %3760 = vrcp.f32 %v495_v62 }
 0x6d6   :  { %v3761_v63 = vpop.eup %3760 }
 0x6d7   :  { %v502_v5 = vmul.f32 %v3761_v63, %v500_v4 }
 0x73a   :  { %v505_v2 = vpop.permute.xlu0 %504 }
 0x73b   :  { %v507_v3 = vmul.f32 %v3761_v63, %v505_v2 }
 0x73d   :  { %509 = vrot.lane.b32.xlu1 %v507_v3, %s4085_s3 }
 0x7af   :  { %v510_v6 = vpop.permute.xlu1 %509 }
 0x7b0   :  { %v512_v7 = vadd.f32 %v510_v6, %v502_v5 }
 0x7b2   :  { %3762 = vtanh.f32 %v512_v7  ;;  %v607_v30 = vrot.slane %v512_v7, 6 }
 0x7bc   :  { %v3763_v9 = vpop.eup %3762 }
 0x7bd   :  { %515 = vrot.lane.b32.xlu0 %v3763_v9, %s4084_s20 }
 0x82f   :  { %v516_v10 = vpop.permute.xlu0 %515 }
 0x830   :  { %v518_v11 = vmul.f32 %v3761_v63, %v516_v10 }
 0x832   :  { %v520_v14 = vrot.slane %v518_v11, 4  ;;  %v1053_v16 = vsel %vm1052_vm4, %v1051_v13, %v518_v11 }
 0x834   :  { %521 = vrot.lane.b32.xlu1 %v520_v14, %s4085_s3 }
 0x8a6   :  { %v522_v18 = vpop.permute.xlu1 %521 }
 0x8a7   :  { %3302 = vmatmul.mubr.msk.f32.vlgmr.msra.gmra.mrb[4].mxu0 %vm207_vm2, %v522_v18 }
 0x8a8   :  { %3593 = vmatpush3.bf16.msra.mxu0 %v4253_v8  ;;  %3323 = vmatprep.mubr.msk.f32.mxu0 %vm4082_vm0, %v4083_v1 }
 0x8a9   :  { %3594 = vmatprep.subr.bf16.mxu0 %v4081_v0 }
 0x8ac   :  { %3596 = vmatpush3.bf16.msra.mxu0 %v4266_v12 }
 0x8ad   :  { %3603 = vmatprep.subr.bf16.mxu0 %v4081_v0 }
 0x97a   :  { %v591_v19 = vpop.f32.mrb[4].mxu0 }
 0x97b   :  { %v596_v20 = vrot.slane %v591_v19, 2  ;;  %v3303_v21 = vpop.f32.mrb[5].mxu0 }
 0x97d   :  { %v598_v22 = vadd.f32 %v596_v20, %v4291_v17 }
 0x97f   :  { %3764 = vtanh.f32 %v598_v22  ;;  %v3065_v24 = vmul.f32 -1.442695, %v598_v22 }
 0x981   :  { %3766 = vpow2.f32 %v3065_v24 }
 0x989   :  { %v3765_v23 = vpop.eup %3764 }
 0x98a   :  { %611 = vrot.lane.b32.xlu0 %v3765_v23, %s4084_s20 }
 0x98b   :  { %v3767_v25 = vpop.eup %3766 }
 0x98c   :  { %v602_v26 = vadd.f32 1.0, %v3767_v25 }
 0x98e   :  { %3768 = vrcp.f32 %v602_v26 }
 0x998   :  { %v3769_v27 = vpop.eup %3768 }
 0x999   :  { %v609_v31 = vmul.f32 %v3769_v27, %v607_v30 }
 0x9fc   :  { %v612_v28 = vpop.permute.xlu0 %611 }
 0x9fd   :  { %v614_v29 = vmul.f32 %v3769_v27, %v612_v28 }
 0x9ff   :  { %616 = vrot.lane.b32.xlu1 %v614_v29, %s4085_s3 }
 0xa71   :  { %v617_v32 = vpop.permute.xlu1 %616 }
 0xa72   :  { %v619_v33 = vadd.f32 %v617_v32, %v609_v31 }
 0xa74   :  { %3770 = vtanh.f32 %v619_v33  ;;  %v711_v49 = vrot.slane %v619_v33, 6 }
 0xa7e   :  { %v3771_v17 = vpop.eup %3770 }
 0xa7f   :  { %622 = vrot.lane.b32.xlu0 %v3771_v17, %s4084_s20 }
 0xaf1   :  { %v623_v34 = vpop.permute.xlu0 %622 }
 0xaf2   :  { %v625_v35 = vmul.f32 %v3769_v27, %v623_v34 }
 0xaf4   :  { %v627_v36 = vrot.slane %v625_v35, 6  ;;  %v4340_v37 = vsel %vm1054_vm5, %v1053_v16, %v625_v35 }
 0xaf6   :  { %628 = vrot.lane.b32.xlu1 %v627_v36, %s4085_s3 }
 0xb68   :  { %v629_v38 = vpop.permute.xlu1 %628 }
 0xb69   :  { %3313 = vmatmul.mubr.msk.f32.vlgmr.msra.gmra.mrb[4].mxu1 %vm207_vm2, %v629_v38 }
 0xb6a   :  { %3599 = vmatpush3.bf16.msra.mxu1 %v4253_v8  ;;  %3334 = vmatprep.mubr.msk.f32.mxu1 %vm4082_vm0, %v4083_v1 }
 0xb6b   :  { %3600 = vmatprep.subr.bf16.mxu1 %v4081_v0 }
 0xb6e   :  { %3602 = vmatpush3.bf16.msra.mxu1 %v4266_v12 }
 0xc3c   :  { %v698_v39 = vpop.f32.mrb[4].mxu1 }
 0xc3d   :  { %v702_v40 = vadd.f32 %v698_v39, %v4289_v15  ;;  %v3314_v41 = vpop.f32.mrb[5].mxu1 }
 0xc3f   :  { %3772 = vtanh.f32 %v702_v40  ;;  %v3067_v43 = vmul.f32 -1.442695, %v702_v40 }
 0xc41   :  { %3774 = vpow2.f32 %v3067_v43 }
 0xc49   :  { %v3773_v42 = vpop.eup %3772 }
 0xc4a   :  { %715 = vrot.lane.b32.xlu0 %v3773_v42, %s4084_s20 }
 0xc4b   :  { %v3775_v44 = vpop.eup %3774 }
 0xc4c   :  { %v706_v45 = vadd.f32 1.0, %v3775_v44 }
 0xc4e   :  { %3776 = vrcp.f32 %v706_v45 }
 0xc58   :  { %v3777_v46 = vpop.eup %3776 }
 0xc59   :  { %v713_v50 = vmul.f32 %v3777_v46, %v711_v49 }
 0xcbc   :  { %v716_v47 = vpop.permute.xlu0 %715 }
 0xcbd   :  { %v718_v48 = vmul.f32 %v3777_v46, %v716_v47 }
 0xcbf   :  { %720 = vrot.lane.b32.xlu1 %v718_v48, %s4085_s3 }
 0xd31   :  { %v721_v51 = vpop.permute.xlu1 %720 }
 0xd32   :  { %v723_v52 = vadd.f32 %v721_v51, %v713_v50 }
 0xd34   :  { %3778 = vtanh.f32 %v723_v52 }
 0xd3e   :  { %v3779_v53 = vpop.eup %3778 }
 0xd3f   :  { %726 = vrot.lane.b32.xlu0 %v3779_v53, %s4084_s20 }
 0xdb1   :  { %v727_v54 = vpop.permute.xlu0 %726 }
 0xdb2   :  { %v4353_v55 = vmul.f32 %v3777_v46, %v727_v54  ;;  %v1059_v54 = vld [vmem:[#allocation5] sm:$0xff] }
 0xdb4   :  { %731 = vrot.lane.b32.xlu1 %v4353_v55, %s4085_s3 }
 0xe26   :  { %v732_v56 = vpop.permute.xlu1 %731 }
 0xe27   :  { %3324 = vmatmul.mubr.msk.f32.vlgmr.msra.gmra.mrb[6].mxu0 %vm207_vm2, %v732_v56  ;;  %v1063_v56 = vld [vmem:[#allocation7] sm:$0xff] }
 0xe28   :  { %3605 = vmatpush3.bf16.msra.mxu0 %v4253_v8  ;;  %3345 = vmatprep.mubr.msk.f32.mxu0 %vm4082_vm0, %v4083_v1 }
 0xe29   :  { %3606 = vmatprep.subr.bf16.mxu0 %v4081_v0 }
 0xe2c   :  { %3608 = vmatpush3.bf16.msra.mxu0 %v4266_v12  ;;  %v817_v12 = vrot.slane %v723_v52, 6 }
 0xe2d   :  { %3617 = vmatprep.subr.bf16.mxu0 %v4081_v0 }
 0xefa   :  { %v801_v57 = vpop.f32.mrb[6].mxu0 }
 0xefb   :  { %v806_v58 = vrot.slane %v801_v57, 6  ;;  %v3325_v59 = vpop.f32.mrb[7].mxu0 }
 0xefc   :  { %v1061_v59 = vld [vmem:[#allocation5 + $0x10] sm:$0xff] }
 0xefd   :  { %v808_v60 = vadd.f32 %v806_v58, %v4289_v15  ;;  %v1064_v58 = vld [vmem:[#allocation7 + $0x8] sm:$0xff] }
 0xeff   :  { %3780 = vtanh.f32 %v808_v60  ;;  %v3069_v62 = vmul.f32 -1.442695, %v808_v60  ;;  %v1062_v60 = vld [vmem:[#allocation5 + $0x18] sm:$0xff] }
 0xf01   :  { %3782 = vpow2.f32 %v3069_v62  ;;  %v3613_v62 = vpack.c.bf16 %v1062_v60, %v1061_v59 }
 0xf09   :  { %v3781_v61 = vpop.eup %3780 }
 0xf0a   :  { %821 = vrot.lane.b32.xlu0 %v3781_v61, %s4084_s20  ;;  %v4387_v61 = vpack.c.bf16 %v1064_v58, %v1063_v56 }
 0xf0b   :  { %v3783_v8 = vpop.eup %3782 }
 0xf0c   :  { %v812_v63 = vadd.f32 1.0, %v3783_v8  ;;  %v1065_v8 = vld [vmem:[#allocation7 + $0x10] sm:$0xff] }
 0xf0e   :  { %3784 = vrcp.f32 %v812_v63 }
 0xf18   :  { %v3785_v2 = vpop.eup %3784 }
 0xf19   :  { %v819_v5 = vmul.f32 %v3785_v2, %v817_v12 }
 0xf7c   :  { %v822_v3 = vpop.permute.xlu0 %821 }
 0xf7d   :  { %v824_v4 = vmul.f32 %v3785_v2, %v822_v3 }
 0xf7f   :  { %826 = vrot.lane.b32.xlu1 %v824_v4, %s4085_s3 }
 0xff1   :  { %v827_v6 = vpop.permute.xlu1 %826 }
 0xff2   :  { %v829_v7 = vadd.f32 %v827_v6, %v819_v5 }
 0xff4   :  { %3786 = vtanh.f32 %v829_v7  ;;  %v924_v28 = vrot.slane %v829_v7, 6 }
 0xffe   :  { %v3787_v9 = vpop.eup %3786 }
 0xfff   :  { %832 = vrot.lane.b32.xlu0 %v3787_v9, %s4084_s20  ;;  %v3074_v9 = vld [vmem:[%s4660_s6] ss:$0 sm:$0xff] }
0x1071   :  { %v833_v10 = vpop.permute.xlu0 %832 }
0x1072   :  { %v835_v11 = vmul.f32 %v3785_v2, %v833_v10 }
0x1074   :  { %v837_v13 = vrot.slane %v835_v11, 2  ;;  %v1056_v34 = vsel %vm1050_vm3, %v4353_v55, %v835_v11  ;;  %v1060_v55 = vld [vmem:[#allocation5 + $0x8] sm:$0xff] }
0x1075   :  { %v3609_v57 = vpack.c.bf16 %v1060_v55, %v1059_v54 }
0x1076   :  { %838 = vrot.lane.b32.xlu1 %v837_v13, %s4085_s3 }
0x1077   :  { %3610 = vmatprep.subr.bf16.mxu1 %v3609_v57 }
0x10e8   :  { %v839_v14 = vpop.permute.xlu1 %838 }
0x10e9   :  { %3335 = vmatmul.mubr.msk.f32.vlgmr.msra.gmra.mrb[6].mxu1 %vm207_vm2, %v839_v14 }
0x10ea   :  { %3612 = vmatpush3.bf16.msra.mxu1 %v3609_v57 }
0x10eb   :  { %3614 = vmatprep.subr.bf16.mxu1 %v3613_v62 }
0x10ee   :  { %3616 = vmatpush3.bf16.msra.mxu1 %v3613_v62 }
0x10ef   :  { %3623 = vmatprep.subr.bf16.mxu1 %v4081_v0 }
0x11bc   :  { %v908_v16 = vpop.f32.mrb[6].mxu1 }
0x11bd   :  { %v913_v18 = vrot.slane %v908_v16, 4  ;;  %v3336_v19 = vpop.f32.mrb[7].mxu1 }
0x11bf   :  { %v915_v20 = vadd.f32 %v913_v18, %v4289_v15 }
0x11c1   :  { %3788 = vtanh.f32 %v915_v20  ;;  %v3071_v22 = vmul.f32 -1.442695, %v915_v20 }
0x11c3   :  { %3790 = vpow2.f32 %v3071_v22 }
0x11cb   :  { %v3789_v21 = vpop.eup %3788 }
0x11cc   :  { %928 = vrot.lane.b32.xlu0 %v3789_v21, %s4084_s20 }
0x11cd   :  { %v3791_v23 = vpop.eup %3790 }
0x11ce   :  { %v919_v24 = vadd.f32 1.0, %v3791_v23 }
0x11d0   :  { %3792 = vrcp.f32 %v919_v24 }
0x11da   :  { %v3793_v25 = vpop.eup %3792 }
0x11db   :  { %v926_v29 = vmul.f32 %v3793_v25, %v924_v28 }
0x123e   :  { %v929_v26 = vpop.permute.xlu0 %928 }
0x123f   :  { %v931_v27 = vmul.f32 %v3793_v25, %v929_v26 }
0x1241   :  { %933 = vrot.lane.b32.xlu1 %v931_v27, %s4085_s3 }
0x12b3   :  { %v934_v30 = vpop.permute.xlu1 %933 }
0x12b4   :  { %v936_v31 = vadd.f32 %v934_v30, %v926_v29 }
0x12b6   :  { %3794 = vtanh.f32 %v936_v31  ;;  %v1031_v50 = vrot.slane %v936_v31, 6 }
0x12c0   :  { %v3795_v32 = vpop.eup %3794 }
0x12c1   :  { %939 = vrot.lane.b32.xlu0 %v3795_v32, %s4084_s20 }
0x1333   :  { %v940_v33 = vpop.permute.xlu0 %939 }
0x1334   :  { %v942_v17 = vmul.f32 %v3793_v25, %v940_v33 }
0x1336   :  { %v944_v35 = vrot.slane %v942_v17, 4  ;;  %v1057_v36 = vsel %vm1052_vm4, %v1056_v34, %v942_v17 }
0x1338   :  { %945 = vrot.lane.b32.xlu1 %v944_v35, %s4085_s3 }
0x13aa   :  { %v946_v38 = vpop.permute.xlu1 %945 }
0x13ab   :  { %3346 = vmatmul.mubr.msk.f32.vlgmr.msra.gmra.mrb[8].mxu0 %vm207_vm2, %v946_v38 }
0x13ac   :  { %3367 = vmatprep.mubr.msk.f32.mxu0 %vm4082_vm0, %v4083_v1  ;;  %3619 = vmatpush3.bf16.msra.mxu0 %v4387_v61 }
0x13ad   :  { %3620 = vmatprep.subr.bf16.mxu0 %v4081_v0 }
0x147e   :  { %v1015_v39 = vpop.f32.mrb[8].mxu0 }
0x147f   :  { %v1020_v40 = vrot.slane %v1015_v39, 2  ;;  %v3347_v41 = vpop.f32.mrb[9].mxu0 }
0x1481   :  { %v1022_v42 = vadd.f32 %v1020_v40, %v4289_v15 }
0x1483   :  { %3796 = vtanh.f32 %v1022_v42  ;;  %v3073_v44 = vmul.f32 -1.442695, %v1022_v42 }
0x1485   :  { %3798 = vpow2.f32 %v3073_v44 }
0x148d   :  { %v3797_v43 = vpop.eup %3796 }
0x148e   :  { %1035 = vrot.lane.b32.xlu0 %v3797_v43, %s4084_s20 }
0x148f   :  { %v3799_v45 = vpop.eup %3798 }
0x1490   :  { %v1026_v46 = vadd.f32 1.0, %v3799_v45 }
0x1492   :  { %3800 = vrcp.f32 %v1026_v46 }
0x149c   :  { %v3801_v47 = vpop.eup %3800 }
0x149d   :  { %v1033_v51 = vmul.f32 %v3801_v47, %v1031_v50 }
0x1500   :  { %v1036_v48 = vpop.permute.xlu0 %1035 }
0x1501   :  { %v1038_v49 = vmul.f32 %v3801_v47, %v1036_v48 }
0x1503   :  { %1040 = vrot.lane.b32.xlu1 %v1038_v49, %s4085_s3 }
0x1507   :  { %1076 = vrot.lane.b32.xlu1 %v4340_v37, %s4085_s3  ;;  %v1066_v37 = vld [vmem:[#allocation7 + $0x18] sm:$0xff] }
0x1508   :  { %v4390_v63 = vpack.c.bf16 %v1066_v37, %v1065_v8 }
0x150a   :  { %3622 = vmatpush3.bf16.msra.mxu0 %v4390_v63 }
0x150b   :  { %3629 = vmatprep.subr.bf16.mxu0 %v4081_v0 }
0x150d   :  { %3368 = vmatmul.mubr.f32.vlgmr.msra.gmra.mrb[10].mxu0 %v4083_v1 }
0x150e   :  { %3631 = vmatpush3.bf16.msra.mxu0 %v4387_v61  ;;  %3389 = vmatprep.mubr.msk.f32.mxu0 %vm4082_vm0, %v4083_v1 }
0x150f   :  { %3632 = vmatprep.subr.bf16.mxu0 %v4081_v0 }
0x1512   :  { %3634 = vmatpush3.bf16.msra.mxu0 %v4390_v63 }
0x1513   :  { %3641 = vmatprep.subr.bf16.mxu0 %v4081_v0 }
0x1575   :  { %v1041_v15 = vpop.permute.xlu1 %1040 }
0x1576   :  { %v1043_v52 = vadd.f32 %v1041_v15, %v1033_v51 }
0x1578   :  { %3802 = vtanh.f32 %v1043_v52 }
0x1579   :  { %v1077_v53 = vpop.permute.xlu1 %1076 }
0x157a   :  { %3356 = vmatprep.mubr.msk.f32.mxu1 %vm207_vm2, %v1077_v53 }
0x1582   :  { %v3803_v2 = vpop.eup %3802 }
0x1583   :  { %1046 = vrot.lane.b32.xlu0 %v3803_v2, %s4084_s20 }
0x15e0   :  { %v1225_v6 = vpop.f32.mrb[10].mxu0 }
0x15e1   :  { %v3369_v7 = vpop.f32.mrb[11].mxu0 }
0x15f5   :  { %v1047_v3 = vpop.permute.xlu0 %1046 }
0x15f6   :  { %v1049_v4 = vmul.f32 %v3801_v47, %v1047_v3 }
0x15f8   :  { %v1058_v12 = vsel %vm1054_vm5, %v1057_v36, %v1049_v4 }
0x15f9   :  { %1078 = vrot.lane.b32.xlu0 %v1058_v12, %s4085_s3 }
0x166b   :  { %v1079_v5 = vpop.permute.xlu0 %1078 }
0x166c   :  { %3357 = vmatmul.mubr.msk.f32.vlgmr.msra.gmra.mrb[8].mxu1 %vm207_vm2, %v1079_v5 }
0x166d   :  { %3625 = vmatpush3.bf16.msra.mxu1 %v4387_v61  ;;  %3378 = vmatprep.mubr.msk.f32.mxu1 %vm4082_vm0, %v4083_v1 }
0x166e   :  { %3626 = vmatprep.subr.bf16.mxu1 %v4081_v0 }
0x1671   :  { %3628 = vmatpush3.bf16.msra.mxu1 %v4390_v63 }
0x1672   :  { %3635 = vmatprep.subr.bf16.mxu1 %v4081_v0 }
0x173f   :  { %v3358_v10 = vpop.f32.mrb[8].mxu1 }
0x1740   :  { %v4416_v11 = vadd.f32 %v3358_v10, %v3074_v9  ;;  %v1150_v13 = vpop.f32.mrb[9].mxu1 }
0x1741   :  { %v4418_v14 = vadd.f32 %v3074_v9, %v1150_v13 }
0x1743   :  { %v1229_v16 = vadd.f32 %v1225_v6, %v4418_v14 }
0x1745   :  { %3804 = vtanh.f32 %v1229_v16  ;;  %v3077_v19 = vmul.f32 -1.442695, %v1229_v16 }
0x1747   :  { %3806 = vpow2.f32 %v3077_v19 }
0x174f   :  { %v3805_v18 = vpop.eup %3804 }
0x1750   :  { %1239 = vrot.lane.b32.xlu1 %v3805_v18, %s4084_s20 }
0x1751   :  { %v3807_v20 = vpop.eup %3806 }
0x1752   :  { %v1233_v21 = vadd.f32 1.0, %v3807_v20 }
0x1754   :  { %3808 = vrcp.f32 %v1233_v21 }
0x175e   :  { %v3809_v22 = vpop.eup %3808 }
0x175f   :  { %v1237_v25 = vmul.f32 0.0, %v3809_v22 }
0x17c2   :  { %v1240_v23 = vpop.permute.xlu1 %1239 }
0x17c3   :  { %v1242_v24 = vmul.f32 %v3809_v22, %v1240_v23 }
0x17c5   :  { %1244 = vrot.lane.b32.xlu0 %v1242_v24, %s4085_s3 }
0x1837   :  { %v1245_v26 = vpop.permute.xlu0 %1244 }
0x1838   :  { %v1247_v27 = vadd.f32 %v1245_v26, %v1237_v25 }
0x183a   :  { %3810 = vtanh.f32 %v1247_v27  ;;  %v1341_v43 = vrot.slane %v1247_v27, 6 }
0x1844   :  { %v3811_v28 = vpop.eup %3810 }
0x1845   :  { %1250 = vrot.lane.b32.xlu1 %v3811_v28, %s4084_s20 }
0x18b7   :  { %v1251_v29 = vpop.permute.xlu1 %1250 }
0x18b8   :  { %v4424_v30 = vmul.f32 %v3809_v22, %v1251_v29 }
0x18ba   :  { %1255 = vrot.lane.b32.xlu0 %v4424_v30, %s4085_s3 }
0x192c   :  { %v1256_v31 = vpop.permute.xlu0 %1255 }
0x192d   :  { %3379 = vmatmul.mubr.msk.f32.vlgmr.msra.gmra.mrb[10].mxu1 %vm207_vm2, %v1256_v31 }
0x192e   :  { %3637 = vmatpush3.bf16.msra.mxu1 %v4387_v61  ;;  %3400 = vmatprep.mubr.msk.f32.mxu1 %vm4082_vm0, %v4083_v1 }
0x192f   :  { %3638 = vmatprep.subr.bf16.mxu1 %v4081_v0 }
0x1932   :  { %3640 = vmatpush3.bf16.msra.mxu1 %v4390_v63 }
0x1933   :  { %3647 = vmatprep.subr.bf16.mxu1 %v4081_v0 }
0x1a00   :  { %v1325_v32 = vpop.f32.mrb[10].mxu1 }
0x1a01   :  { %v1330_v33 = vrot.slane %v1325_v32, 6  ;;  %v3380_v17 = vpop.f32.mrb[11].mxu1 }
0x1a03   :  { %v1332_v34 = vadd.f32 %v1330_v33, %v4418_v14 }
0x1a05   :  { %3812 = vtanh.f32 %v1332_v34  ;;  %v3079_v36 = vmul.f32 -1.442695, %v1332_v34 }
0x1a07   :  { %3814 = vpow2.f32 %v3079_v36 }
0x1a0f   :  { %v3813_v35 = vpop.eup %3812 }
0x1a10   :  { %1345 = vrot.lane.b32.xlu1 %v3813_v35, %s4084_s20 }
0x1a11   :  { %v3815_v38 = vpop.eup %3814 }
0x1a12   :  { %v1336_v39 = vadd.f32 1.0, %v3815_v38 }
0x1a14   :  { %3816 = vrcp.f32 %v1336_v39 }
0x1a1e   :  { %v3817_v40 = vpop.eup %3816 }
0x1a1f   :  { %v1343_v44 = vmul.f32 %v3817_v40, %v1341_v43 }
0x1a82   :  { %v1346_v41 = vpop.permute.xlu1 %1345 }
0x1a83   :  { %v1348_v42 = vmul.f32 %v3817_v40, %v1346_v41 }
0x1a85   :  { %1350 = vrot.lane.b32.xlu0 %v1348_v42, %s4085_s3 }
0x1af7   :  { %v1351_v45 = vpop.permute.xlu0 %1350 }
0x1af8   :  { %v1353_v46 = vadd.f32 %v1351_v45, %v1343_v44 }
0x1afa   :  { %3818 = vtanh.f32 %v1353_v46  ;;  %v1448_v8 = vrot.slane %v1353_v46, 6 }
0x1b04   :  { %v3819_v47 = vpop.eup %3818 }
0x1b05   :  { %1356 = vrot.lane.b32.xlu1 %v3819_v47, %s4084_s20 }
0x1b77   :  { %v1357_v48 = vpop.permute.xlu1 %1356 }
0x1b78   :  { %v1359_v49 = vmul.f32 %v3817_v40, %v1357_v48 }
0x1b7a   :  { %v1361_v50 = vrot.slane %v1359_v49, 2  ;;  %v1998_v6 = vsel %vm1050_vm3, %v4424_v30, %v1359_v49 }
0x1b7c   :  { %1362 = vrot.lane.b32.xlu0 %v1361_v50, %s4085_s3 }
0x1bee   :  { %v1363_v51 = vpop.permute.xlu0 %1362 }
0x1bef   :  { %3390 = vmatmul.mubr.msk.f32.vlgmr.msra.gmra.mrb[12].mxu0 %vm207_vm2, %v1363_v51 }
0x1bf0   :  { %3643 = vmatpush3.bf16.msra.mxu0 %v4387_v61  ;;  %3411 = vmatprep.mubr.msk.f32.mxu0 %vm4082_vm0, %v4083_v1 }
0x1bf1   :  { %3644 = vmatprep.subr.bf16.mxu0 %v4081_v0 }
0x1bf4   :  { %3646 = vmatpush3.bf16.msra.mxu0 %v4390_v63 }
0x1bf5   :  { %3653 = vmatprep.subr.bf16.mxu0 %v4081_v0 }
0x1cc2   :  { %v1432_v15 = vpop.f32.mrb[12].mxu0 }
0x1cc3   :  { %v1437_v52 = vrot.slane %v1432_v15, 4  ;;  %v3391_v53 = vpop.f32.mrb[13].mxu0 }
0x1cc5   :  { %v1439_v54 = vadd.f32 %v1437_v52, %v4418_v14 }
0x1cc7   :  { %3820 = vtanh.f32 %v1439_v54  ;;  %v3081_v56 = vmul.f32 -1.442695, %v1439_v54 }
0x1cc9   :  { %3822 = vpow2.f32 %v3081_v56 }
0x1cd1   :  { %v3821_v55 = vpop.eup %3820 }
0x1cd2   :  { %1452 = vrot.lane.b32.xlu1 %v3821_v55, %s4084_s20 }
0x1cd3   :  { %v3823_v57 = vpop.eup %3822 }
0x1cd4   :  { %v1443_v58 = vadd.f32 1.0, %v3823_v57 }
0x1cd6   :  { %3824 = vrcp.f32 %v1443_v58 }
0x1ce0   :  { %v3825_v59 = vpop.eup %3824 }
0x1ce1   :  { %v1450_v37 = vmul.f32 %v3825_v59, %v1448_v8 }
0x1d44   :  { %v1453_v60 = vpop.permute.xlu1 %1452 }
0x1d45   :  { %v1455_v62 = vmul.f32 %v3825_v59, %v1453_v60 }
0x1d47   :  { %1457 = vrot.lane.b32.xlu0 %v1455_v62, %s4085_s3 }
0x1db9   :  { %v1458_v2 = vpop.permute.xlu0 %1457 }
0x1dba   :  { %v1460_v3 = vadd.f32 %v1458_v2, %v1450_v37 }
0x1dbc   :  { %3826 = vtanh.f32 %v1460_v3  ;;  %v1555_v27 = vrot.slane %v1460_v3, 6 }
0x1dc6   :  { %v3827_v4 = vpop.eup %3826 }
0x1dc7   :  { %1463 = vrot.lane.b32.xlu1 %v3827_v4, %s4084_s20 }
0x1e39   :  { %v1464_v12 = vpop.permute.xlu1 %1463 }
0x1e3a   :  { %v1466_v5 = vmul.f32 %v3825_v59, %v1464_v12 }
0x1e3c   :  { %v1468_v7 = vrot.slane %v1466_v5, 4  ;;  %v1999_v9 = vsel %vm1052_vm4, %v1998_v6, %v1466_v5 }
0x1e3e   :  { %1469 = vrot.lane.b32.xlu0 %v1468_v7, %s4085_s3 }
0x1eb0   :  { %v1470_v10 = vpop.permute.xlu0 %1469 }
0x1eb1   :  { %3401 = vmatmul.mubr.msk.f32.vlgmr.msra.gmra.mrb[12].mxu1 %vm207_vm2, %v1470_v10 }
0x1eb2   :  { %3649 = vmatpush3.bf16.msra.mxu1 %v4387_v61  ;;  %3422 = vmatprep.mubr.msk.f32.mxu1 %vm4082_vm0, %v4083_v1 }
0x1eb3   :  { %3650 = vmatprep.subr.bf16.mxu1 %v4081_v0 }
0x1eb6   :  { %3652 = vmatpush3.bf16.msra.mxu1 %v4390_v63 }
0x1eb7   :  { %3659 = vmatprep.subr.bf16.mxu1 %v4081_v0 }
0x1f84   :  { %v1539_v13 = vpop.f32.mrb[12].mxu1 }
0x1f85   :  { %v1544_v16 = vrot.slane %v1539_v13, 2  ;;  %v3402_v18 = vpop.f32.mrb[13].mxu1 }
0x1f87   :  { %v1546_v19 = vadd.f32 %v1544_v16, %v4418_v14 }
0x1f89   :  { %3828 = vtanh.f32 %v1546_v19  ;;  %v3083_v21 = vmul.f32 -1.442695, %v1546_v19 }
0x1f8b   :  { %3830 = vpow2.f32 %v3083_v21 }
0x1f93   :  { %v3829_v20 = vpop.eup %3828 }
0x1f94   :  { %1559 = vrot.lane.b32.xlu1 %v3829_v20, %s4084_s20 }
0x1f95   :  { %v3831_v22 = vpop.eup %3830 }
0x1f96   :  { %v1550_v23 = vadd.f32 1.0, %v3831_v22 }
0x1f98   :  { %3832 = vrcp.f32 %v1550_v23 }
0x1fa2   :  { %v3833_v24 = vpop.eup %3832 }
0x1fa3   :  { %v1557_v28 = vmul.f32 %v3833_v24, %v1555_v27 }
0x2006   :  { %v1560_v25 = vpop.permute.xlu1 %1559 }
0x2007   :  { %v1562_v26 = vmul.f32 %v3833_v24, %v1560_v25 }
0x2009   :  { %1564 = vrot.lane.b32.xlu0 %v1562_v26, %s4085_s3 }
0x207b   :  { %v1565_v29 = vpop.permute.xlu0 %1564 }
0x207c   :  { %v1567_v30 = vadd.f32 %v1565_v29, %v1557_v28 }
0x207e   :  { %3834 = vtanh.f32 %v1567_v30  ;;  %v1659_v46 = vrot.slane %v1567_v30, 6 }
0x2088   :  { %v3835_v14 = vpop.eup %3834 }
0x2089   :  { %1570 = vrot.lane.b32.xlu1 %v3835_v14, %s4084_s20 }
0x20fb   :  { %v1571_v31 = vpop.permute.xlu1 %1570 }
0x20fc   :  { %v1573_v32 = vmul.f32 %v3833_v24, %v1571_v31 }
0x20fe   :  { %v1575_v33 = vrot.slane %v1573_v32, 6  ;;  %v4467_v17 = vsel %vm1054_vm5, %v1999_v9, %v1573_v32 }
0x2100   :  { %1576 = vrot.lane.b32.xlu0 %v1575_v33, %s4085_s3 }
0x2172   :  { %v1577_v34 = vpop.permute.xlu0 %1576 }
0x2173   :  { %3412 = vmatmul.mubr.msk.f32.vlgmr.msra.gmra.mrb[14].mxu0 %vm207_vm2, %v1577_v34 }
0x2174   :  { %3655 = vmatpush3.bf16.msra.mxu0 %v4387_v61  ;;  %3433 = vmatprep.mubr.msk.f32.mxu0 %vm4082_vm0, %v4083_v1 }
0x2175   :  { %3656 = vmatprep.subr.bf16.mxu0 %v4081_v0 }
0x2178   :  { %3658 = vmatpush3.bf16.msra.mxu0 %v4390_v63 }
0x2246   :  { %v1646_v35 = vpop.f32.mrb[14].mxu0 }
0x2247   :  { %v1650_v36 = vadd.f32 %v1646_v35, %v4416_v11  ;;  %v3413_v38 = vpop.f32.mrb[15].mxu0 }
0x2249   :  { %3836 = vtanh.f32 %v1650_v36  ;;  %v3085_v40 = vmul.f32 -1.442695, %v1650_v36 }
0x224b   :  { %3838 = vpow2.f32 %v3085_v40 }
0x2253   :  { %v3837_v39 = vpop.eup %3836 }
0x2254   :  { %1663 = vrot.lane.b32.xlu1 %v3837_v39, %s4084_s20 }
0x2255   :  { %v3839_v41 = vpop.eup %3838 }
0x2256   :  { %v1654_v42 = vadd.f32 1.0, %v3839_v41 }
0x2258   :  { %3840 = vrcp.f32 %v1654_v42 }
0x2262   :  { %v3841_v43 = vpop.eup %3840 }
0x2263   :  { %v1661_v47 = vmul.f32 %v3841_v43, %v1659_v46 }
0x22c6   :  { %v1664_v44 = vpop.permute.xlu1 %1663 }
0x22c7   :  { %v1666_v45 = vmul.f32 %v3841_v43, %v1664_v44 }
0x22c9   :  { %1668 = vrot.lane.b32.xlu0 %v1666_v45, %s4085_s3 }
0x233b   :  { %v1669_v48 = vpop.permute.xlu0 %1668 }
0x233c   :  { %v1671_v49 = vadd.f32 %v1669_v48, %v1661_v47 }
0x233e   :  { %3842 = vtanh.f32 %v1671_v49 }
0x2348   :  { %v3843_v50 = vpop.eup %3842 }
0x2349   :  { %1674 = vrot.lane.b32.xlu1 %v3843_v50, %s4084_s20 }
0x23bb   :  { %v1675_v51 = vpop.permute.xlu1 %1674 }
0x23bc   :  { %v4480_v15 = vmul.f32 %v3841_v43, %v1675_v51  ;;  %v2004_v51 = vld [vmem:[%s4661_s7] sm:$0xff] }
0x23be   :  { %1679 = vrot.lane.b32.xlu0 %v4480_v15, %s4085_s3 }
0x2430   :  { %v1680_v52 = vpop.permute.xlu0 %1679 }
0x2431   :  { %3423 = vmatmul.mubr.msk.f32.vlgmr.msra.gmra.mrb[14].mxu1 %vm207_vm2, %v1680_v52  ;;  %v2008_v52 = vld [vmem:[#allocation8] sm:$0xff] }
0x2432   :  { %3661 = vmatpush3.bf16.msra.mxu1 %v4387_v61  ;;  %3444 = vmatprep.mubr.msk.f32.mxu1 %vm4082_vm0, %v4083_v1 }
0x2433   :  { %3662 = vmatprep.subr.bf16.mxu1 %v4081_v0 }
0x2436   :  { %3664 = vmatpush3.bf16.msra.mxu1 %v4390_v63  ;;  %v1765_v63 = vrot.slane %v1671_v49, 6 }
0x2437   :  { %3673 = vmatprep.subr.bf16.mxu1 %v4081_v0 }
0x2504   :  { %v1749_v53 = vpop.f32.mrb[14].mxu1 }
0x2505   :  { %v1754_v54 = vrot.slane %v1749_v53, 6  ;;  %v3424_v55 = vpop.f32.mrb[15].mxu1 }
0x2506   :  { %v2007_v55 = vld [vmem:[%s4661_s7 + $0x18] sm:$0xff] }
0x2507   :  { %v1756_v56 = vadd.f32 %v1754_v54, %v4416_v11  ;;  %v2009_v54 = vld [vmem:[#allocation8 + $0x8] sm:$0xff] }
0x2509   :  { %3844 = vtanh.f32 %v1756_v56  ;;  %v3087_v58 = vmul.f32 -1.442695, %v1756_v56  ;;  %v4526_v56 = vpack.c.bf16 %v2009_v54, %v2008_v52 }
0x250b   :  { %3846 = vpow2.f32 %v3087_v58  ;;  %v2010_v58 = vld [vmem:[#allocation8 + $0x10] sm:$0xff] }
0x2513   :  { %v3845_v57 = vpop.eup %3844 }
0x2514   :  { %1769 = vrot.lane.b32.xlu1 %v3845_v57, %s4084_s20 }
0x2515   :  { %v3847_v61 = vpop.eup %3846 }
0x2516   :  { %v1760_v59 = vadd.f32 1.0, %v3847_v61  ;;  %v2011_v61 = vld [vmem:[#allocation8 + $0x18] sm:$0xff] }
0x2518   :  { %3848 = vrcp.f32 %v1760_v59  ;;  %v4529_v59 = vpack.c.bf16 %v2011_v61, %v2010_v58 }
0x2522   :  { %v3849_v60 = vpop.eup %3848 }
0x2523   :  { %v1767_v37 = vmul.f32 %v3849_v60, %v1765_v63 }
0x2586   :  { %v1770_v62 = vpop.permute.xlu1 %1769 }
0x2587   :  { %v1772_v8 = vmul.f32 %v3849_v60, %v1770_v62 }
0x2589   :  { %1774 = vrot.lane.b32.xlu0 %v1772_v8, %s4085_s3 }
0x25fb   :  { %v1775_v2 = vpop.permute.xlu0 %1774 }
0x25fc   :  { %v1777_v3 = vadd.f32 %v1775_v2, %v1767_v37 }
0x25fe   :  { %3850 = vtanh.f32 %v1777_v3  ;;  %v1872_v25 = vrot.slane %v1777_v3, 6 }
0x2608   :  { %v3851_v4 = vpop.eup %3850 }
0x2609   :  { %1780 = vrot.lane.b32.xlu1 %v3851_v4, %s4084_s20  ;;  %v3092_v4 = vld [vmem:[%s4663_s9] ss:$0 sm:$0xff] }
0x267b   :  { %v1781_v12 = vpop.permute.xlu1 %1780 }
0x267c   :  { %v1783_v5 = vmul.f32 %v3849_v60, %v1781_v12 }
0x267e   :  { %v1785_v6 = vrot.slane %v1783_v5, 2  ;;  %v2001_v31 = vsel %vm1050_vm3, %v4480_v15, %v1783_v5  ;;  %v2005_v15 = vld [vmem:[%s4661_s7 + $0x8] sm:$0xff] }
0x267f   :  { %v3665_v53 = vpack.c.bf16 %v2005_v15, %v2004_v51 }
0x2680   :  { %1786 = vrot.lane.b32.xlu0 %v1785_v6, %s4085_s3 }
0x2681   :  { %3666 = vmatprep.subr.bf16.mxu0 %v3665_v53 }
0x26f2   :  { %v1787_v7 = vpop.permute.xlu0 %1786 }
0x26f3   :  { %3434 = vmatmul.mubr.msk.f32.vlgmr.msra.gmra.mrb[16].mxu0 %vm207_vm2, %v1787_v7 }
0x26f4   :  { %3668 = vmatpush3.bf16.msra.mxu0 %v3665_v53 }
0x27c6   :  { %v1856_v9 = vpop.f32.mrb[16].mxu0 }
0x27c7   :  { %v1861_v10 = vrot.slane %v1856_v9, 4  ;;  %v3435_v13 = vpop.f32.mrb[17].mxu0 }
0x27c9   :  { %v1863_v16 = vadd.f32 %v1861_v10, %v4416_v11 }
0x27cb   :  { %3852 = vtanh.f32 %v1863_v16  ;;  %v3089_v19 = vmul.f32 -1.442695, %v1863_v16 }
0x27cd   :  { %3854 = vpow2.f32 %v3089_v19 }
0x27d5   :  { %v3853_v18 = vpop.eup %3852 }
0x27d6   :  { %1876 = vrot.lane.b32.xlu1 %v3853_v18, %s4084_s20 }
0x27d7   :  { %v3855_v20 = vpop.eup %3854 }
0x27d8   :  { %v1867_v21 = vadd.f32 1.0, %v3855_v20 }
0x27da   :  { %3856 = vrcp.f32 %v1867_v21 }
0x27e4   :  { %v3857_v22 = vpop.eup %3856 }
0x27e5   :  { %v1874_v26 = vmul.f32 %v3857_v22, %v1872_v25 }
0x2848   :  { %v1877_v23 = vpop.permute.xlu1 %1876 }
0x2849   :  { %v1879_v24 = vmul.f32 %v3857_v22, %v1877_v23 }
0x284b   :  { %1881 = vrot.lane.b32.xlu0 %v1879_v24, %s4085_s3 }
0x28bd   :  { %v1882_v27 = vpop.permute.xlu0 %1881 }
0x28be   :  { %v1884_v28 = vadd.f32 %v1882_v27, %v1874_v26 }
0x28c0   :  { %3858 = vtanh.f32 %v1884_v28  ;;  %v1979_v47 = vrot.slane %v1884_v28, 6 }
0x28ca   :  { %v3859_v29 = vpop.eup %3858 }
0x28cb   :  { %1887 = vrot.lane.b32.xlu1 %v3859_v29, %s4084_s20 }
0x293d   :  { %v1888_v30 = vpop.permute.xlu1 %1887 }
0x293e   :  { %v1890_v14 = vmul.f32 %v3857_v22, %v1888_v30 }
0x2940   :  { %v1892_v32 = vrot.slane %v1890_v14, 4  ;;  %v2002_v33 = vsel %vm1052_vm4, %v2001_v31, %v1890_v14 }
0x2942   :  { %1893 = vrot.lane.b32.xlu0 %v1892_v32, %s4085_s3 }
0x29b4   :  { %v1894_v34 = vpop.permute.xlu0 %1893 }
0x29b5   :  { %3445 = vmatmul.mubr.msk.f32.vlgmr.msra.gmra.mrb[16].mxu1 %vm207_vm2, %v1894_v34 }
0x29b6   :  { %3466 = vmatprep.mubr.msk.f32.mxu1 %vm4082_vm0, %v4083_v1  ;;  %3675 = vmatpush3.bf16.msra.mxu1 %v4526_v56 }
0x29b7   :  { %3676 = vmatprep.subr.bf16.mxu1 %v4081_v0 }
0x29ba   :  { %3678 = vmatpush3.bf16.msra.mxu1 %v4529_v59 }
0x29bb   :  { %3685 = vmatprep.subr.bf16.mxu1 %v4081_v0 }
0x29bd   :  { %3467 = vmatmul.mubr.f32.vlgmr.msra.gmra.mrb[18].mxu1 %v4083_v1 }
0x29be   :  { %3687 = vmatpush3.bf16.msra.mxu1 %v4526_v56  ;;  %3488 = vmatprep.mubr.msk.f32.mxu1 %vm4082_vm0, %v4083_v1 }
0x29bf   :  { %3688 = vmatprep.subr.bf16.mxu1 %v4081_v0 }
0x29c2   :  { %3690 = vmatpush3.bf16.msra.mxu1 %v4529_v59 }
0x29c3   :  { %3697 = vmatprep.subr.bf16.mxu1 %v4081_v0 }
0x2a88   :  { %v1963_v35 = vpop.f32.mrb[16].mxu1 }
0x2a89   :  { %v1968_v36 = vrot.slane %v1963_v35, 2  ;;  %v3446_v38 = vpop.f32.mrb[17].mxu1 }
0x2a8b   :  { %v1970_v39 = vadd.f32 %v1968_v36, %v4416_v11 }
0x2a8d   :  { %3860 = vtanh.f32 %v1970_v39  ;;  %v3091_v41 = vmul.f32 -1.442695, %v1970_v39 }
0x2a8f   :  { %3862 = vpow2.f32 %v3091_v41 }
0x2a90   :  { %v2170_v2 = vpop.f32.mrb[18].mxu1 }
0x2a91   :  { %v3468_v3 = vpop.f32.mrb[19].mxu1 }
0x2a97   :  { %v3861_v40 = vpop.eup %3860 }
0x2a98   :  { %1983 = vrot.lane.b32.xlu1 %v3861_v40, %s4084_s20 }
0x2a99   :  { %v3863_v42 = vpop.eup %3862 }
0x2a9a   :  { %v1974_v43 = vadd.f32 1.0, %v3863_v42 }
0x2a9c   :  { %3864 = vrcp.f32 %v1974_v43 }
0x2aa6   :  { %v3865_v44 = vpop.eup %3864 }
0x2aa7   :  { %v1981_v48 = vmul.f32 %v3865_v44, %v1979_v47 }
0x2b0a   :  { %v1984_v45 = vpop.permute.xlu1 %1983 }
0x2b0b   :  { %v1986_v46 = vmul.f32 %v3865_v44, %v1984_v45 }
0x2b0d   :  { %1988 = vrot.lane.b32.xlu0 %v1986_v46, %s4085_s3 }
0x2b11   :  { %2021 = vrot.lane.b32.xlu0 %v4467_v17, %s4085_s3  ;;  %v2006_v17 = vld [vmem:[%s4661_s7 + $0x10] sm:$0xff] }
0x2b12   :  { %v3669_v57 = vpack.c.bf16 %v2007_v55, %v2006_v17 }
0x2b14   :  { %3670 = vmatprep.subr.bf16.mxu0 %v3669_v57 }
0x2b15   :  { %3672 = vmatpush3.bf16.msra.mxu0 %v3669_v57 }
0x2b16   :  { %3679 = vmatprep.subr.bf16.mxu0 %v4081_v0 }
0x2b7f   :  { %v1989_v11 = vpop.permute.xlu0 %1988 }
0x2b80   :  { %v1991_v49 = vadd.f32 %v1989_v11, %v1981_v48 }
0x2b82   :  { %3866 = vtanh.f32 %v1991_v49 }
0x2b83   :  { %v2022_v50 = vpop.permute.xlu0 %2021 }
0x2b84   :  { %3455 = vmatprep.mubr.msk.f32.mxu0 %vm207_vm2, %v2022_v50 }
0x2b8c   :  { %v3867_v60 = vpop.eup %3866 }
0x2b8d   :  { %1994 = vrot.lane.b32.xlu1 %v3867_v60, %s4084_s20 }
0x2bff   :  { %v1995_v62 = vpop.permute.xlu1 %1994 }
0x2c00   :  { %v1997_v8 = vmul.f32 %v3865_v44, %v1995_v62 }
0x2c02   :  { %v2003_v63 = vsel %vm1054_vm5, %v2002_v33, %v1997_v8 }
0x2c03   :  { %2023 = vrot.lane.b32.xlu1 %v2003_v63, %s4085_s3 }
0x2c75   :  { %v2024_v37 = vpop.permute.xlu1 %2023 }
0x2c76   :  { %3456 = vmatmul.mubr.msk.f32.vlgmr.msra.gmra.mrb[18].mxu0 %vm207_vm2, %v2024_v37 }
0x2c77   :  { %3681 = vmatpush3.bf16.msra.mxu0 %v4526_v56  ;;  %3477 = vmatprep.mubr.msk.f32.mxu0 %vm4082_vm0, %v4083_v1 }
0x2c78   :  { %3682 = vmatprep.subr.bf16.mxu0 %v4081_v0 }
0x2c7b   :  { %3684 = vmatpush3.bf16.msra.mxu0 %v4529_v59 }
0x2c7c   :  { %3691 = vmatprep.subr.bf16.mxu0 %v4081_v0 }
0x2d49   :  { %v3457_v12 = vpop.f32.mrb[18].mxu0 }
0x2d4a   :  { %v4555_v5 = vadd.f32 %v3457_v12, %v3092_v4  ;;  %v2095_v6 = vpop.f32.mrb[19].mxu0 }
0x2d4b   :  { %v4557_v7 = vadd.f32 %v3092_v4, %v2095_v6 }
0x2d4d   :  { %v2174_v9 = vadd.f32 %v2170_v2, %v4557_v7 }
0x2d4f   :  { %3868 = vtanh.f32 %v2174_v9  ;;  %v3095_v13 = vmul.f32 -1.442695, %v2174_v9 }
0x2d51   :  { %3870 = vpow2.f32 %v3095_v13 }
0x2d59   :  { %v3869_v10 = vpop.eup %3868 }
0x2d5a   :  { %2184 = vrot.lane.b32.xlu0 %v3869_v10, %s4084_s20 }
0x2d5b   :  { %v3871_v16 = vpop.eup %3870 }
0x2d5c   :  { %v2178_v18 = vadd.f32 1.0, %v3871_v16 }
0x2d5e   :  { %3872 = vrcp.f32 %v2178_v18 }
0x2d68   :  { %v3873_v19 = vpop.eup %3872 }
0x2d69   :  { %v2182_v22 = vmul.f32 0.0, %v3873_v19 }
0x2dcc   :  { %v2185_v20 = vpop.permute.xlu0 %2184 }
0x2dcd   :  { %v2187_v21 = vmul.f32 %v3873_v19, %v2185_v20 }
0x2dcf   :  { %2189 = vrot.lane.b32.xlu1 %v2187_v21, %s4085_s3 }
0x2e41   :  { %v2190_v23 = vpop.permute.xlu1 %2189 }
0x2e42   :  { %v2192_v24 = vadd.f32 %v2190_v23, %v2182_v22 }
0x2e44   :  { %3874 = vtanh.f32 %v2192_v24  ;;  %v2286_v40 = vrot.slane %v2192_v24, 6 }
0x2e4e   :  { %v3875_v25 = vpop.eup %3874 }
0x2e4f   :  { %2195 = vrot.lane.b32.xlu0 %v3875_v25, %s4084_s20 }
0x2ec1   :  { %v2196_v26 = vpop.permute.xlu0 %2195 }
0x2ec2   :  { %v2198_v27 = vmul.f32 %v3873_v19, %v2196_v26 }
0x2ec4   :  { %2200 = vrot.lane.b32.xlu1 %v2198_v27, %s4085_s3 }
0x2f36   :  { %v2201_v28 = vpop.permute.xlu1 %2200 }
0x2f37   :  { %3478 = vmatmul.mubr.msk.f32.vlgmr.msra.gmra.mrb[20].mxu0 %vm207_vm2, %v2201_v28 }
0x2f38   :  { %3693 = vmatpush3.bf16.msra.mxu0 %v4526_v56  ;;  %3499 = vmatprep.mubr.msk.f32.mxu0 %vm4082_vm0, %v4083_v1 }
0x2f39   :  { %3694 = vmatprep.subr.bf16.mxu0 %v4081_v0 }
0x2f3c   :  { %3696 = vmatpush3.bf16.msra.mxu0 %v4529_v59 }
0x2f3d   :  { %3703 = vmatprep.subr.bf16.mxu0 %v4081_v0 }
0x300a   :  { %v2270_v29 = vpop.f32.mrb[20].mxu0 }
0x300b   :  { %v2275_v30 = vrot.slane %v2270_v29, 6  ;;  %v3479_v14 = vpop.f32.mrb[21].mxu0 }
0x300d   :  { %v2277_v31 = vadd.f32 %v2275_v30, %v4557_v7 }
0x300f   :  { %3876 = vtanh.f32 %v2277_v31  ;;  %v3097_v33 = vmul.f32 -1.442695, %v2277_v31 }
0x3011   :  { %3878 = vpow2.f32 %v3097_v33 }
0x3019   :  { %v3877_v32 = vpop.eup %3876 }
0x301a   :  { %2290 = vrot.lane.b32.xlu0 %v3877_v32, %s4084_s20 }
0x301b   :  { %v3879_v34 = vpop.eup %3878 }
0x301c   :  { %v2281_v35 = vadd.f32 1.0, %v3879_v34 }
0x301e   :  { %3880 = vrcp.f32 %v2281_v35 }
0x3028   :  { %v3881_v36 = vpop.eup %3880 }
0x3029   :  { %v2288_v41 = vmul.f32 %v3881_v36, %v2286_v40 }
0x308c   :  { %v2291_v38 = vpop.permute.xlu0 %2290 }
0x308d   :  { %v2293_v39 = vmul.f32 %v3881_v36, %v2291_v38 }
0x308f   :  { %2295 = vrot.lane.b32.xlu1 %v2293_v39, %s4085_s3 }
0x3101   :  { %v2296_v42 = vpop.permute.xlu1 %2295 }
0x3102   :  { %v2298_v43 = vadd.f32 %v2296_v42, %v2288_v41 }
0x3104   :  { %3882 = vtanh.f32 %v2298_v43  ;;  %v2393_v58 = vrot.slane %v2298_v43, 6 }
0x310e   :  { %v3883_v44 = vpop.eup %3882 }
0x310f   :  { %2301 = vrot.lane.b32.xlu0 %v3883_v44, %s4084_s20 }
0x3181   :  { %v2302_v45 = vpop.permute.xlu0 %2301 }
0x3182   :  { %v2304_v46 = vmul.f32 %v3881_v36, %v2302_v45 }
0x3184   :  { %v2306_v47 = vrot.slane %v2304_v46, 2 }
0x3186   :  { %2307 = vrot.lane.b32.xlu1 %v2306_v47, %s4085_s3 }
0x31f8   :  { %v2308_v48 = vpop.permute.xlu1 %2307 }
0x31f9   :  { %3489 = vmatmul.mubr.msk.f32.vlgmr.msra.gmra.mrb[20].mxu1 %vm207_vm2, %v2308_v48 }
0x31fa   :  { %3699 = vmatpush3.bf16.msra.mxu1 %v4526_v56  ;;  %3510 = vmatprep.mubr.msk.f32.mxu1 %vm4082_vm0, %v4083_v1 }
0x31fb   :  { %3700 = vmatprep.subr.bf16.mxu1 %v4081_v0 }
0x31fe   :  { %3702 = vmatpush3.bf16.msra.mxu1 %v4529_v59 }
0x31ff   :  { %3709 = vmatprep.subr.bf16.mxu1 %v4081_v0 }
0x32cc   :  { %v2377_v11 = vpop.f32.mrb[20].mxu1 }
0x32cd   :  { %v2382_v49 = vrot.slane %v2377_v11, 4  ;;  %v3490_v50 = vpop.f32.mrb[21].mxu1 }
0x32cf   :  { %v2384_v51 = vadd.f32 %v2382_v49, %v4557_v7 }
0x32d1   :  { %3884 = vtanh.f32 %v2384_v51  ;;  %v3099_v52 = vmul.f32 -1.442695, %v2384_v51 }
0x32d3   :  { %3886 = vpow2.f32 %v3099_v52 }
0x32db   :  { %v3885_v15 = vpop.eup %3884 }
0x32dc   :  { %2397 = vrot.lane.b32.xlu0 %v3885_v15, %s4084_s20 }
0x32dd   :  { %v3887_v53 = vpop.eup %3886 }
0x32de   :  { %v2388_v54 = vadd.f32 1.0, %v3887_v53 }
0x32e0   :  { %3888 = vrcp.f32 %v2388_v54 }
0x32ea   :  { %v3889_v17 = vpop.eup %3888 }
0x32eb   :  { %v2395_v61 = vmul.f32 %v3889_v17, %v2393_v58 }
0x334e   :  { %v2398_v55 = vpop.permute.xlu0 %2397 }
0x334f   :  { %v2400_v57 = vmul.f32 %v3889_v17, %v2398_v55 }
0x3351   :  { %2402 = vrot.lane.b32.xlu1 %v2400_v57, %s4085_s3 }
0x33c3   :  { %v2403_v60 = vpop.permute.xlu1 %2402 }
0x33c4   :  { %v2405_v62 = vadd.f32 %v2403_v60, %v2395_v61 }
0x33c6   :  { %3890 = vtanh.f32 %v2405_v62  ;;  %v2500_v22 = vrot.slane %v2405_v62, 6 }
0x33d0   :  { %v3891_v8 = vpop.eup %3890 }
0x33d1   :  { %2408 = vrot.lane.b32.xlu0 %v3891_v8, %s4084_s20 }
0x3443   :  { %v2409_v63 = vpop.permute.xlu0 %2408 }
0x3444   :  { %v2411_v37 = vmul.f32 %v3889_v17, %v2409_v63 }
0x3446   :  { %v2413_v2 = vrot.slane %v2411_v37, 4 }
0x3448   :  { %2414 = vrot.lane.b32.xlu1 %v2413_v2, %s4085_s3 }
0x34ba   :  { %v2415_v3 = vpop.permute.xlu1 %2414 }
0x34bb   :  { %3500 = vmatmul.mubr.msk.f32.vlgmr.msra.gmra.mrb[22].mxu0 %vm207_vm2, %v2415_v3 }
0x34bc   :  { %3705 = vmatpush3.bf16.msra.mxu0 %v4526_v56  ;;  %3521 = vmatprep.mubr.msk.f32.mxu0 %vm4082_vm0, %v4083_v1 }
0x34bd   :  { %3706 = vmatprep.subr.bf16.mxu0 %v4081_v0 }
0x34c0   :  { %3708 = vmatpush3.bf16.msra.mxu0 %v4529_v59 }
0x34c1   :  { %3715 = vmatprep.subr.bf16.mxu0 %v4081_v0 }
0x358e   :  { %v2484_v4 = vpop.f32.mrb[22].mxu0 }
0x358f   :  { %v2489_v12 = vrot.slane %v2484_v4, 2  ;;  %v3501_v6 = vpop.f32.mrb[23].mxu0 }
0x3591   :  { %v2491_v9 = vadd.f32 %v2489_v12, %v4557_v7 }
0x3593   :  { %3892 = vtanh.f32 %v2491_v9  ;;  %v3101_v13 = vmul.f32 -1.442695, %v2491_v9 }
0x3595   :  { %3894 = vpow2.f32 %v3101_v13 }
0x359d   :  { %v3893_v10 = vpop.eup %3892 }
0x359e   :  { %2504 = vrot.lane.b32.xlu0 %v3893_v10, %s4084_s20 }
0x359f   :  { %v3895_v16 = vpop.eup %3894 }
0x35a0   :  { %v2495_v18 = vadd.f32 1.0, %v3895_v16 }
0x35a2   :  { %3896 = vrcp.f32 %v2495_v18 }
0x35ac   :  { %v3897_v19 = vpop.eup %3896 }
0x35ad   :  { %v2502_v23 = vmul.f32 %v3897_v19, %v2500_v22 }
0x3610   :  { %v2505_v20 = vpop.permute.xlu0 %2504 }
0x3611   :  { %v2507_v21 = vmul.f32 %v3897_v19, %v2505_v20 }
0x3613   :  { %2509 = vrot.lane.b32.xlu1 %v2507_v21, %s4085_s3 }
0x3685   :  { %v2510_v24 = vpop.permute.xlu1 %2509 }
0x3686   :  { %v2512_v25 = vadd.f32 %v2510_v24, %v2502_v23 }
0x3688   :  { %3898 = vtanh.f32 %v2512_v25  ;;  %v2604_v40 = vrot.slane %v2512_v25, 6 }
0x3692   :  { %v3899_v7 = vpop.eup %3898 }
0x3693   :  { %2515 = vrot.lane.b32.xlu0 %v3899_v7, %s4084_s20 }
0x3705   :  { %v2516_v26 = vpop.permute.xlu0 %2515 }
0x3706   :  { %v2518_v27 = vmul.f32 %v3897_v19, %v2516_v26 }
0x3708   :  { %v2520_v28 = vrot.slane %v2518_v27, 6 }
0x370a   :  { %2521 = vrot.lane.b32.xlu1 %v2520_v28, %s4085_s3 }
0x377c   :  { %v2522_v29 = vpop.permute.xlu1 %2521 }
0x377d   :  { %3511 = vmatmul.mubr.msk.f32.vlgmr.msra.gmra.mrb[22].mxu1 %vm207_vm2, %v2522_v29 }
0x377e   :  { %3711 = vmatpush3.bf16.msra.mxu1 %v4526_v56  ;;  %3532 = vmatprep.mubr.msk.f32.mxu1 %vm4082_vm0, %v4083_v1 }
0x377f   :  { %3712 = vmatprep.subr.bf16.mxu1 %v4081_v0 }
0x3782   :  { %3714 = vmatpush3.bf16.msra.mxu1 %v4529_v59 }
0x3783   :  { %3721 = vmatprep.subr.bf16.mxu1 %v4081_v0 }
0x3850   :  { %v2591_v30 = vpop.f32.mrb[22].mxu1 }
0x3851   :  { %v2595_v14 = vadd.f32 %v2591_v30, %v4555_v5  ;;  %v3512_v31 = vpop.f32.mrb[23].mxu1 }
0x3853   :  { %3900 = vtanh.f32 %v2595_v14  ;;  %v3103_v33 = vmul.f32 -1.442695, %v2595_v14 }
0x3855   :  { %3902 = vpow2.f32 %v3103_v33 }
0x385d   :  { %v3901_v32 = vpop.eup %3900 }
0x385e   :  { %2608 = vrot.lane.b32.xlu0 %v3901_v32, %s4084_s20 }
0x385f   :  { %v3903_v34 = vpop.eup %3902 }
0x3860   :  { %v2599_v35 = vadd.f32 1.0, %v3903_v34 }
0x3862   :  { %3904 = vrcp.f32 %v2599_v35 }
0x386c   :  { %v3905_v36 = vpop.eup %3904 }
0x386d   :  { %v2606_v41 = vmul.f32 %v3905_v36, %v2604_v40 }
0x38d0   :  { %v2609_v38 = vpop.permute.xlu0 %2608 }
0x38d1   :  { %v2611_v39 = vmul.f32 %v3905_v36, %v2609_v38 }
0x38d3   :  { %2613 = vrot.lane.b32.xlu1 %v2611_v39, %s4085_s3 }
0x3945   :  { %v2614_v42 = vpop.permute.xlu1 %2613 }
0x3946   :  { %v2616_v43 = vadd.f32 %v2614_v42, %v2606_v41  ;;  %v2944_v41 = vld [vmem:[#allocation10 + $0x8] sm:$0xff]  ;;  %v2945_v42 = vld [vmem:[#allocation10 + $0x10] sm:$0xff] }
0x3948   :  { %3906 = vtanh.f32 %v2616_v43 }
0x3952   :  { %v3907_v44 = vpop.eup %3906 }
0x3953   :  { %2619 = vrot.lane.b32.xlu0 %v3907_v44, %s4084_s20  ;;  %v2946_v44 = vld [vmem:[#allocation10 + $0x18] sm:$0xff] }
0x39c5   :  { %v2620_v45 = vpop.permute.xlu0 %2619 }
0x39c6   :  { %v2622_v46 = vmul.f32 %v3905_v36, %v2620_v45  ;;  %v3725_v45 = vpack.c.bf16 %v2946_v44, %v2945_v42 }
0x39c8   :  { %2624 = vrot.lane.b32.xlu1 %v2622_v46, %s4085_s3 }
0x3a3a   :  { %v2625_v47 = vpop.permute.xlu1 %2624 }
0x3a3b   :  { %3522 = vmatmul.mubr.msk.f32.vlgmr.msra.gmra.mrb[24].mxu0 %vm207_vm2, %v2625_v47 }
0x3a3c   :  { %3717 = vmatpush3.bf16.msra.mxu0 %v4526_v56  ;;  %3543 = vmatprep.mubr.msk.f32.mxu0 %vm4082_vm0, %v4083_v1 }
0x3a3d   :  { %3718 = vmatprep.subr.bf16.mxu0 %v4081_v0 }
0x3a40   :  { %3720 = vmatpush3.bf16.msra.mxu0 %v4529_v59  ;;  %v2710_v59 = vrot.slane %v2616_v43, 6 }
0x3b0e   :  { %v2694_v48 = vpop.f32.mrb[24].mxu0 }
0x3b0f   :  { %v2699_v11 = vrot.slane %v2694_v48, 6  ;;  %v3523_v49 = vpop.f32.mrb[25].mxu0 }
0x3b11   :  { %v2701_v50 = vadd.f32 %v2699_v11, %v4555_v5 }
0x3b13   :  { %3908 = vtanh.f32 %v2701_v50  ;;  %v3105_v15 = vmul.f32 -1.442695, %v2701_v50  ;;  %v3110_v50 = vld [vmem:[%s4665_s11] ss:$0 sm:$0xff] }
0x3b15   :  { %3910 = vpow2.f32 %v3105_v15 }
0x3b1d   :  { %v3909_v51 = vpop.eup %3908 }
0x3b1e   :  { %2714 = vrot.lane.b32.xlu0 %v3909_v51, %s4084_s20 }
0x3b1f   :  { %v3911_v52 = vpop.eup %3910 }
0x3b20   :  { %v2705_v56 = vadd.f32 1.0, %v3911_v52 }
0x3b22   :  { %3912 = vrcp.f32 %v2705_v56 }
0x3b2c   :  { %v3913_v53 = vpop.eup %3912 }
0x3b2d   :  { %v2712_v55 = vmul.f32 %v3913_v53, %v2710_v59 }
0x3b90   :  { %v2715_v54 = vpop.permute.xlu0 %2714 }
0x3b91   :  { %v2717_v17 = vmul.f32 %v3913_v53, %v2715_v54 }
0x3b93   :  { %2719 = vrot.lane.b32.xlu1 %v2717_v17, %s4085_s3 }
0x3c05   :  { %v2720_v57 = vpop.permute.xlu1 %2719 }
0x3c06   :  { %v2722_v58 = vadd.f32 %v2720_v57, %v2712_v55 }
0x3c08   :  { %3914 = vtanh.f32 %v2722_v58 }
0x3c12   :  { %v3915_v61 = vpop.eup %3914 }
0x3c13   :  { %2725 = vrot.lane.b32.xlu0 %v3915_v61, %s4084_s20 }
0x3c85   :  { %v2726_v60 = vpop.permute.xlu0 %2725 }
0x3c86   :  { %v2728_v62 = vmul.f32 %v3913_v53, %v2726_v60 }
0x3c88   :  { %v2730_v8 = vrot.slane %v2728_v62, 2 }
0x3c8a   :  { %2731 = vrot.lane.b32.xlu1 %v2730_v8, %s4085_s3 }
0x3cfc   :  { %v2732_v63 = vpop.permute.xlu1 %2731 }
0x3cfd   :  { %3533 = vmatmul.mubr.msk.f32.vlgmr.msra.gmra.mrb[24].mxu1 %vm207_vm2, %v2732_v63 }
0x3cfe   :  { %3554 = vmatprep.mubr.msk.f32.mxu1 %vm4082_vm0, %v4083_v1  ;;  %v2817_v1 = vrot.slane %v2722_v58, 6 }
0x3dd0   :  { %v2801_v37 = vpop.f32.mrb[24].mxu1 }
0x3dd1   :  { %v2806_v2 = vrot.slane %v2801_v37, 4  ;;  %v3534_v3 = vpop.f32.mrb[25].mxu1 }
0x3dd3   :  { %v2808_v4 = vadd.f32 %v2806_v2, %v4555_v5 }
0x3dd5   :  { %3916 = vtanh.f32 %v2808_v4  ;;  %v3107_v6 = vmul.f32 -1.442695, %v2808_v4 }
0x3dd7   :  { %3918 = vpow2.f32 %v3107_v6 }
0x3ddf   :  { %v3917_v12 = vpop.eup %3916 }
0x3de0   :  { %2821 = vrot.lane.b32.xlu0 %v3917_v12, %s4084_s20 }
0x3de1   :  { %v3919_v9 = vpop.eup %3918 }
0x3de2   :  { %v2812_v10 = vadd.f32 1.0, %v3919_v9 }
0x3de4   :  { %3920 = vrcp.f32 %v2812_v10 }
0x3dee   :  { %v3921_v13 = vpop.eup %3920 }
0x3def   :  { %v2819_v19 = vmul.f32 %v3921_v13, %v2817_v1 }
0x3e52   :  { %v2822_v16 = vpop.permute.xlu0 %2821 }
0x3e53   :  { %v2824_v18 = vmul.f32 %v3921_v13, %v2822_v16 }
0x3e55   :  { %2826 = vrot.lane.b32.xlu1 %v2824_v18, %s4085_s3 }
0x3ec7   :  { %v2827_v20 = vpop.permute.xlu1 %2826 }
0x3ec8   :  { %v2829_v21 = vadd.f32 %v2827_v20, %v2819_v19 }
0x3eca   :  { %3922 = vtanh.f32 %v2829_v21  ;;  %v2924_v36 = vrot.slane %v2829_v21, 6 }
0x3ed4   :  { %v3923_v22 = vpop.eup %3922 }
0x3ed5   :  { %2832 = vrot.lane.b32.xlu0 %v3923_v22, %s4084_s20 }
0x3f47   :  { %v2833_v23 = vpop.permute.xlu0 %2832 }
0x3f48   :  { %v2835_v24 = vmul.f32 %v3921_v13, %v2833_v23 }
0x3f4a   :  { %v2837_v25 = vrot.slane %v2835_v24, 4 }
0x3f4c   :  { %2838 = vrot.lane.b32.xlu1 %v2837_v25, %s4085_s3 }
0x3fbe   :  { %v2839_v7 = vpop.permute.xlu1 %2838 }
0x3fbf   :  { %3544 = vmatmul.mubr.msk.f32.vlgmr.msra.gmra.mrb[26].mxu0 %vm207_vm2, %v2839_v7 }
0x4092   :  { %v2908_v26 = vpop.f32.mrb[26].mxu0 }
0x4093   :  { %v2913_v27 = vrot.slane %v2908_v26, 2  ;;  %v3545_v28 = vpop.f32.mrb[27].mxu0 }
0x4095   :  { %v2915_v29 = vadd.f32 %v2913_v27, %v4555_v5  ;;  %v2943_v5 = vld [vmem:[#allocation10] sm:$0xff] }
0x4096   :  { %v3722_v43 = vpack.c.bf16 %v2944_v41, %v2943_v5 }
0x4097   :  { %3924 = vtanh.f32 %v2915_v29  ;;  %v3109_v14 = vmul.f32 -1.442695, %v2915_v29 }
0x4098   :  { %3723 = vmatpush3.bf16.msra.mxu1 %v3722_v43 }
0x4099   :  { %3926 = vpow2.f32 %v3109_v14  ;;  %3724 = vmatprep.subr.bf16.mxu1 %v4081_v0 }
0x409c   :  { %3726 = vmatpush3.bf16.msra.mxu1 %v3725_v45 }
0x40a1   :  { %v3925_v30 = vpop.eup %3924 }
0x40a2   :  { %2928 = vrot.lane.b32.xlu0 %v3925_v30, %s4084_s20 }
0x40a3   :  { %v3927_v31 = vpop.eup %3926 }
0x40a4   :  { %v2919_v32 = vadd.f32 1.0, %v3927_v31 }
0x40a6   :  { %3928 = vrcp.f32 %v2919_v32 }
0x40b0   :  { %v3929_v33 = vpop.eup %3928 }
0x40b1   :  { %v2926_v38 = vmul.f32 %v3929_v33, %v2924_v36 }
0x4114   :  { %v2929_v34 = vpop.permute.xlu0 %2928 }
0x4115   :  { %v2931_v35 = vmul.f32 %v3929_v33, %v2929_v34 }
0x4117   :  { %2933 = vrot.lane.b32.xlu1 %v2931_v35, %s4085_s3 }
0x4189   :  { %v2934_v39 = vpop.permute.xlu1 %2933 }
0x418a   :  { %v2936_v40 = vadd.f32 %v2934_v39, %v2926_v38 }
0x418c   :  { %3930 = vtanh.f32 %v2936_v40 }
0x4196   :  { %v3931_v46 = vpop.eup %3930 }
0x4197   :  { %2939 = vrot.lane.b32.xlu0 %v3931_v46, %s4084_s20 }
0x4209   :  { %v2940_v47 = vpop.permute.xlu0 %2939 }
0x420a   :  { %v2942_v48 = vmul.f32 %v3929_v33, %v2940_v47 }
0x420c   :  { %v2955_v11 = vrot.slane %v2942_v48, 6 }
0x420e   :  { %2956 = vrot.lane.b32.xlu1 %v2955_v11, %s4085_s3 }
0x4280   :  { %v2957_v49 = vpop.permute.xlu1 %2956 }
0x4281   :  { %3555 = vmatmul.mubr.msk.f32.vlgmr.msra.gmra.mrb[26].mxu1 %vm207_vm2, %v2957_v49 }
0x4354   :  { %v3026_v51 = vpop.f32.mrb[26].mxu1 }
0x4355   :  { %v3027_v15 = vadd.f32 %v3110_v50, %v3026_v51  ;;  %v3556_v52 = vpop.f32.mrb[27].mxu1 }
0x4357   :  { %v3030_v0 = vmax.f32 %v3027_v15, 0.0 }
0x4359   :  { %v3031_v56 = vmul.f32 %v3030_v0, %v3030_v0 }
0x435b   :  { %v3033_v53 = vsel %vm3032_vm6, %v3031_v56, 0.0 }
0x435c   :  { %3034 = vadd.xlane.f32.xlu0 %v3033_v53 }
0x43e9   :  { %v3035_v54 = vpop.xlane.xlu0 %3034 }
0x43ea   :  { %3932 = vrsqrt.f32 %v3035_v54 }
0x43f4   :  { %v3933_v17 = vpop.eup %3932 }
0x43f5   :  { %v3037_v59 = vmul.f32 %v3933_v17, %v3030_v0 }
0x43f7   :  { %3038 = vst.msk [vmem:[#allocation11] sm:$0x3] %vm3032_vm6, %v3037_v59 }
0x43f8   :  { %4055 = shalt.err (!%p4052_p2)
}
0x43f9   :  { %s4056_s29 = scalar_lea.hbm %s4666_s12, 32 }
0x43fa   :  { %p4057_p3 = scmp.ne.s32.totalorder %s4666_s12, %s4056_s29  ;;  %p4060_p4 = scmp.lt.u32.totalorder %s4056_s29, %s4666_s12 }
0x43fc   :  { %p4062_p5 = pnand %p4060_p4, %p4057_p3 }
0x43fe   :  { %4065 = shalt.err (!%p4062_p5)
}
0x43ff   :  { %3048 = dma.vmem_to_hbm [thread:$0]  %s3046_s10, 32, %s4666_s12, [#allocation4]  }
0x4400   :  { %4072 = dma.done.wait [#allocation4], 32  }
0x4401   :  { %4073 = vsyncadd [#allocation4], 4294967264 }
0x4402   :  { %3052 = vsyncpa [#allocation3], 1 }
0x4403   :  { %3053 = vsyncpa [#allocation6], 1 }
0x4404   :  { %3054 = vsyncpa [#allocation9], 1 }
0x4405   :  { %3055 = vsyncpa [#allocation4], 1 }

</bundles_post_ra>
